<compile_context>
chip_gen: v6e
topology: v6e:2x2x1
jax: 0.10.0
libtpu: 0.0.40
codegen_flags: <defaults>
</compile_context>

<pallas_src>
import jax
import jax.numpy as jnp
from jax.experimental import pallas as pl
from jax.experimental.pallas import tpu as pltpu


def _round_up(x, m):
    return (x + m - 1) // m * m


def rnn_decoder_step_kernel(attn_enc_ref, enc_ref, hid0_ref, emb_ref,
                            wda_ref, wv_ref,
                            wg_ref, bg_ref, bhn_ref,
                            wf_ref, bf_ref,
                            logits_ref, aux_ref,
                            h_carry):
    f32 = jnp.float32
    bf16 = jnp.bfloat16

    t = pl.program_id(0)

    @pl.when(t == 0)
    def _():
        h_carry[...] = hid0_ref[...]          # attention hidden for step 0

    B, D = h_carry.shape
    L = enc_ref.shape[1]

    hidden = h_carry[...]                      # (B, D) f32, carried across steps

    # ---- Bahdanau attention (attn_enc = enc @ W_ea precomputed in the wrapper) ----
    attn_dec = jnp.dot(hidden.astype(bf16), wda_ref[...],
                       preferred_element_type=f32)                      # (B, A)
    ah = jnp.tanh(attn_enc_ref[...] + attn_dec[:, None, :])             # (B, L, A)
    score = jnp.sum(ah * wv_ref[...][None, :, :], axis=-1)              # (B, L)
    score = score - jnp.max(score, axis=-1, keepdims=True)              # stable softmax
    es = jnp.exp(score)
    attn_w = es * pl.reciprocal(jnp.sum(es, axis=-1, keepdims=True), approx=True)
    # TODO(synk): at realistic L, do this on the MXU:
    #   ctx = jnp.einsum('bl,ble->be', attn_w, enc_ref[...], preferred_element_type=f32)
    ctx = jnp.sum(attn_w[:, :, None] * enc_ref[...], axis=1)            # (B, E), f32

    # ---- single-step GRU, h0 = 0 (PyTorch gate order [r | z | n]) ----
    # One fused gate matmul: x = [ctx | emb] (64 lanes), W_g = [Wc ; We] padded to 128.
    x = jnp.concatenate([ctx, emb_ref[0]], axis=-1).astype(bf16)        # (B, E+M)
    gates = jnp.dot(x, wg_ref[...], preferred_element_type=f32) + bg_ref[...]  # (B, 128)
    r = jax.nn.sigmoid(gates[:, 0:D])
    z = jax.nn.sigmoid(gates[:, D:2 * D])
    n = jnp.tanh(gates[:, 2 * D:3 * D] + r * bhn_ref[...])
    h_new = (1.0 - z) * n                                               # (+ z*h0, h0 == 0)

    # ---- fused FC head: fc_2(fc_1(h)) as one matmul (lane-padded, f32 weights) ----
    logits = jnp.dot(h_new, wf_ref[...], preferred_element_type=f32) + bf_ref[...]

    # ---- lane-dense stores ----
    logits_ref[0] = logits                                              # (B, V_pad)
    pad = aux_ref.shape[-1] - D - L
    pieces = [h_new, attn_w]
    if pad > 0:
        pieces.append(jnp.zeros((B, pad), f32))
    aux_ref[0] = jnp.concatenate(pieces, axis=-1)                       # (B, AUX_pad)

    h_carry[...] = h_new                                                # feeds next step


def prepare_decoder_params(params):
    """One-time transform of PyTorch-layout params into the fused kernel layout."""
    E = params["W_ea"].shape[0]
    M = params["embedding"].shape[1]
    D = params["W_da"].shape[0]
    V = params["b2"].shape[-1]
    v_pad = _round_up(V, 128)
    g_pad = _round_up(3 * D, 128)

    W_ih = params["W_ih_T"]                      # (E+M, 3D); rows ordered [ctx | emb]
    b_ih, b_hh = params["b_ih"], params["b_hh"]  # (1, 3D) each, gate order [r|z|n]

    # h0 == 0 inside each step's GRU call => hidden path contributes only b_hh:
    #   r,z gates: bias = b_ih + b_hh ;  n gate: b_ih directly, b_hh enters via r*b_hn.
    b_g = jnp.concatenate([b_ih[:, :2 * D] + b_hh[:, :2 * D], b_ih[:, 2 * D:]], axis=-1)
    W_g = jnp.zeros((E + M, g_pad), jnp.float32).at[:, :3 * D].set(W_ih).astype(jnp.bfloat16)
    b_g = jnp.zeros((1, g_pad), jnp.float32).at[:, :3 * D].set(b_g)

    # Fused fc_2(fc_1(.)) — no nonlinearity between; keep in f32 (wider dynamic range).
    W_fused = params["W1_T"] @ params["W2_T"]                     # (D, V)
    b_fused = params["b1"] @ params["W2_T"] + params["b2"]        # (1, V)
    W_fused_p = jnp.zeros((D, v_pad), jnp.float32).at[:, :V].set(W_fused)
    b_fused_p = jnp.zeros((1, v_pad), jnp.float32).at[:, :V].set(b_fused)

    return dict(
        embedding=params["embedding"],
        W_ea=params["W_ea"],                       # f32; applied in the wrapper
        W_da=params["W_da"].astype(jnp.bfloat16),
        w_v=params["w_v"],                         # f32 (elementwise on VPU)
        W_g=W_g, b_g=b_g,
        b_hn=params["b_hh"][:, 2 * D:],
        W_fused=W_fused_p, b_fused=b_fused_p,
        vocab_size=V, decoder_dim=D, embedding_dim=M, encoder_dim=E,
    )


def rnn_decoder_decode(token_ids, encoder_output, hidden0, prep):
    """Run T decoder steps in ONE kernel launch (teacher-forced token ids).

    token_ids: (T, B) int32.  Step t uses step t-1's output state as the attention
    query (step 0 uses `hidden0`), i.e. exactly T chained calls of the module's
    forward with the returned state fed back in as `hidden`.
    Returns (logits (T,B,V), states (T,B,D), attn_w (T,B,L,1)).
    """
    T, B = token_ids.shape
    _, L, E = encoder_output.shape
    D = prep["decoder_dim"]
    M = prep["embedding_dim"]
    V = prep["vocab_size"]
    A = prep["W_da"].shape[-1]
    v_pad = prep["b_fused"].shape[-1]
    g_pad = prep["W_g"].shape[-1]
    aux_pad = _round_up(D + L, 128)

    # Sublane fill: pad batch to a multiple of 8 so every vreg / store is dense.
    B_p = _round_up(B, 8)
    pad_b = B_p - B
    enc_p = jnp.pad(encoder_output, ((0, pad_b), (0, 0), (0, 0)))
    hid_p = jnp.pad(hidden0, ((0, pad_b), (0, 0)))
    tok_p = jnp.pad(token_ids, ((0, 0), (0, pad_b)))

    # Glue kept in plain JAX: embedding gather + decode-invariant encoder projection.
    emb_all = prep["embedding"][tok_p]                                   # (T, B_p, M)
    attn_enc = jnp.einsum("ble,ea->bla", enc_p, prep["W_ea"])            # (B_p, L, A)

    inv2 = lambda t: (0, 0)
    inv3 = lambda t: (0, 0, 0)
    step2 = lambda t: (t, 0, 0)

    grid_spec = pltpu.PrefetchScalarGridSpec(
        num_scalar_prefetch=0,
        grid=(T,),
        in_specs=[
            pl.BlockSpec((B_p, L, A), inv3),          # attn_enc   (step-invariant)
            pl.BlockSpec((B_p, L, E), inv3),          # enc        (step-invariant)
            pl.BlockSpec((B_p, D), inv2),             # hidden0    (step-invariant)
            pl.BlockSpec((1, B_p, M), step2),         # embeddings (per step)
            pl.BlockSpec((D, A), inv2),               # W_da
            pl.BlockSpec((1, A), inv2),               # w_v
            pl.BlockSpec((E + M, g_pad), inv2),       # W_g  (fused GRU gate weights)
            pl.BlockSpec((1, g_pad), inv2),           # b_g
            pl.BlockSpec((1, D), inv2),               # b_hn
            pl.BlockSpec((D, v_pad), inv2),           # W_fused (fc2 ∘ fc1)
            pl.BlockSpec((1, v_pad), inv2),           # b_fused
        ],
        out_specs=[
            pl.BlockSpec((1, B_p, v_pad), step2),     # logits per step
            pl.BlockSpec((1, B_p, aux_pad), step2),   # [state | attn_w] per step
        ],
        scratch_shapes=[pltpu.VMEM((B_p, D), jnp.float32)],   # carried attention hidden
    )

    logits_p, aux = pl.pallas_call(
        rnn_decoder_step_kernel,
        out_shape=(jax.ShapeDtypeStruct((T, B_p, v_pad), jnp.float32),
                   jax.ShapeDtypeStruct((T, B_p, aux_pad), jnp.float32)),
        grid_spec=grid_spec,
        compiler_params=pltpu.CompilerParams(
            dimension_semantics=("arbitrary",)),      # state carry => sequential steps
    )(attn_enc, enc_p, hid_p, emb_all,
      prep["W_da"], prep["w_v"],
      prep["W_g"], prep["b_g"], prep["b_hn"],
      prep["W_fused"], prep["b_fused"])

    logits = logits_p[:, :B, :V]
    states = aux[:, :B, :D]
    attn_w = aux[:, :B, D:D + L, None]
    return logits, states, attn_w


def rnn_decoder_forward(decoder_input, encoder_output, hidden, prep):
    """Single-step forward matching the PyTorch module exactly (T = 1)."""
    tokens = decoder_input[:, 0][None, :]                                # (1, B)
    logits, states, attn_w = rnn_decoder_decode(tokens, encoder_output, hidden, prep)
    return logits[0], states[0], attn_w[0]


def reference_forward(decoder_input, encoder_output, hidden, params):
    """Pure-JAX f32 reference of the un-fused module math (validates all fusions)."""
    emb = params["embedding"][decoder_input[:, 0]]
    D = hidden.shape[-1]
    attn_enc = jnp.einsum("ble,ea->bla", encoder_output, params["W_ea"])
    attn_dec = hidden @ params["W_da"]
    ah = jnp.tanh(attn_enc + attn_dec[:, None, :])
    score = jnp.sum(ah * params["w_v"][None, :, :], axis=-1)
    attn_w = jax.nn.softmax(score, axis=-1)
    ctx = jnp.sum(attn_w[:, :, None] * encoder_output, axis=1)
    x = jnp.concatenate([ctx, emb], axis=-1)
    h0 = jnp.zeros_like(hidden)
    gi = x @ params["W_ih_T"] + params["b_ih"]
    gh = h0 @ params["W_hh_T"] + params["b_hh"]
    r = jax.nn.sigmoid(gi[:, :D] + gh[:, :D])
    z = jax.nn.sigmoid(gi[:, D:2 * D] + gh[:, D:2 * D])
    n = jnp.tanh(gi[:, 2 * D:] + r * gh[:, 2 * D:])
    h_new = (1.0 - z) * n + z * h0
    y1 = h_new @ params["W1_T"] + params["b1"]
    logits = y1 @ params["W2_T"] + params["b2"]
    return logits, h_new, attn_w[:, :, None]


def init_params(key, E, D, A, M, V):
    ks = jax.random.split(key, 12)

    def lin(k, fan_in, shape):
        bound = 1.0 / jnp.sqrt(jnp.float32(fan_in))
        return jax.random.uniform(k, shape, jnp.float32, -bound, bound)

    return dict(
        embedding=jax.random.normal(ks[0], (V, M), jnp.float32),
        W_ea=lin(ks[1], E, (E, A)),                 # encoder_attn (no bias)
        W_da=lin(ks[2], D, (D, A)),                 # decoder_attn (no bias)
        w_v=lin(ks[3], A, (1, A)),                  # value (no bias)
        W_ih_T=lin(ks[4], E + M, (E + M, 3 * D)),   # GRU input weights [r|z|n]
        W_hh_T=lin(ks[5], D, (D, 3 * D)),           # GRU hidden weights [r|z|n]
        b_ih=lin(ks[6], D, (1, 3 * D)),
        b_hh=lin(ks[7], D, (1, 3 * D)),
        W1_T=lin(ks[8], D, (D, D)),                 # fc_1
        b1=lin(ks[9], D, (1, D)),
        W2_T=lin(ks[10], D, (D, V)),                # fc_2
        b2=lin(ks[11], D, (1, V)),
    )


if __name__ == "__main__":
    B, L, T = 2, 16, 4           # batch, encoder sequence length, decode steps
    E = D = A = M = 32           # encoder_dim, decoder_dim, attention_dim, embedding_dim
    V = 64                       # vocab_size

    key = jax.random.PRNGKey(0)
    kp, ki, ke, kh, kt = jax.random.split(key, 5)
    params = init_params(kp, E, D, A, M, V)
    prep = prepare_decoder_params(params)

    encoder_output = jax.random.normal(ke, (B, L, E), jnp.float32)

    # ---- single step: exactly the module's forward ----
    decoder_input = jax.random.randint(ki, (B, 1), 0, V, dtype=jnp.int32)
    hidden = 0.1 * jax.random.normal(kh, (B, D), jnp.float32)
    logits, state, attn_w = rnn_decoder_forward(decoder_input, encoder_output, hidden, prep)
    jax.block_until_ready((logits, state, attn_w))

    rl, rs, ra = reference_forward(decoder_input, encoder_output, hidden, params)
    assert logits.shape == (B, V) and state.shape == (B, D) and attn_w.shape == (B, L, 1)
    # bf16 matmul operands + approx reciprocal: loosen tolerance slightly vs pure f32.
    assert jnp.allclose(logits, rl, atol=2e-2, rtol=2e-2)
    assert jnp.allclose(state, rs, atol=2e-2, rtol=2e-2)
    assert jnp.allclose(attn_w, ra, atol=2e-2, rtol=2e-2)

    # ---- T-step teacher-forced decode: ONE kernel launch, weights VMEM-resident ----
    tokens = jax.random.randint(kt, (T, B), 0, V, dtype=jnp.int32)
    hidden0 = jnp.zeros((B, D), jnp.float32)        # module's init_hidden
    k_logits, k_states, k_attn = rnn_decoder_decode(tokens, encoder_output, hidden0, prep)
    jax.block_until_ready((k_logits, k_states, k_attn))

    hid = hidden0
    for t in range(T):
        lt, st, at = reference_forward(tokens[t][:, None], encoder_output, hid, params)
        assert jnp.allclose(k_logits[t], lt, atol=2e-2, rtol=2e-2)
        assert jnp.allclose(k_states[t], st, atol=2e-2, rtol=2e-2)
        assert jnp.allclose(k_attn[t], at, atol=2e-2, rtol=2e-2)
        hid = st                                    # returned state feeds next attention

    print("KERNEL_OK")
</pallas_src>

<mosaic_0001>
module attributes {stable_mosaic.version = 11 : i64} {
  func.func @rnn_decoder_step_kernel(%arg0: i32, %arg1: memref<8x16x32xf32, #tpu.memory_space<vmem>>, %arg2: memref<8x16x32xf32, #tpu.memory_space<vmem>>, %arg3: memref<8x32xf32, #tpu.memory_space<vmem>>, %arg4: memref<1x8x32xf32, #tpu.memory_space<vmem>>, %arg5: memref<32x32xbf16, #tpu.memory_space<vmem>>, %arg6: memref<1x32xf32, #tpu.memory_space<vmem>>, %arg7: memref<64x128xbf16, #tpu.memory_space<vmem>>, %arg8: memref<1x128xf32, #tpu.memory_space<vmem>>, %arg9: memref<1x32xf32, #tpu.memory_space<vmem>>, %arg10: memref<32x128xf32, #tpu.memory_space<vmem>>, %arg11: memref<1x128xf32, #tpu.memory_space<vmem>>, %arg12: memref<1x8x128xf32, #tpu.memory_space<vmem>>, %arg13: memref<1x8x128xf32, #tpu.memory_space<vmem>>, %arg14: memref<8x32xf32, #tpu.memory_space<vmem>>) attributes {dimension_semantics = [#tpu.dimension_semantics<arbitrary>], iteration_bounds = array<i64: 1>, scalar_prefetch = 0 : i64, scratch_operands = 1 : i64, tpu.core_type = #tpu.core_type<tc>, window_params = [{pipeline_mode = #tpu.pipeline_mode<synchronous>, transform_indices = @transform_0, window_bounds = array<i64: 8, 16, 32>}, {pipeline_mode = #tpu.pipeline_mode<synchronous>, transform_indices = @transform_1, window_bounds = array<i64: 8, 16, 32>}, {pipeline_mode = #tpu.pipeline_mode<synchronous>, transform_indices = @transform_2, window_bounds = array<i64: 8, 32>}, {transform_indices = @transform_3, window_bounds = array<i64: 1, 8, 32>}, {pipeline_mode = #tpu.pipeline_mode<synchronous>, transform_indices = @transform_4, window_bounds = array<i64: 32, 32>}, {pipeline_mode = #tpu.pipeline_mode<synchronous>, transform_indices = @transform_5, window_bounds = array<i64: 1, 32>}, {pipeline_mode = #tpu.pipeline_mode<synchronous>, transform_indices = @transform_6, window_bounds = array<i64: 64, 128>}, {pipeline_mode = #tpu.pipeline_mode<synchronous>, transform_indices = @transform_7, window_bounds = array<i64: 1, 128>}, {pipeline_mode = #tpu.pipeline_mode<synchronous>, transform_indices = @transform_8, window_bounds = array<i64: 1, 32>}, {pipeline_mode = #tpu.pipeline_mode<synchronous>, transform_indices = @transform_9, window_bounds = array<i64: 32, 128>}, {pipeline_mode = #tpu.pipeline_mode<synchronous>, transform_indices = @transform_10, window_bounds = array<i64: 1, 128>}, {transform_indices = @transform_11, window_bounds = array<i64: 1, 8, 128>}, {transform_indices = @transform_12, window_bounds = array<i64: 1, 8, 128>}]} {
    %c0_i32 = arith.constant 0 : i32
    %0 = arith.cmpi eq, %arg0, %c0_i32 : i32
    %1 = arith.extui %0 : i1 to i32
    %c0_i32_0 = arith.constant 0 : i32
    %2 = arith.cmpi ne, %1, %c0_i32_0 : i32
    scf.if %2 {
      %c0_43 = arith.constant 0 : index
      %c0_44 = arith.constant 0 : index
      %76 = vector.load %arg3[%c0_43, %c0_44] : memref<8x32xf32, #tpu.memory_space<vmem>>, vector<8x32xf32>
      %c0_45 = arith.constant 0 : index
      %c0_46 = arith.constant 0 : index
      %77 = vector.load %arg14[%c0_45, %c0_46] : memref<8x32xf32, #tpu.memory_space<vmem>>, vector<8x32xf32>
      tpu.vector_store %arg14[%c0_45, %c0_46], %76 {strides = array<i32>} : memref<8x32xf32, #tpu.memory_space<vmem>>, vector<8x32xf32>,
    } else {
    }
    %c0 = arith.constant 0 : index
    %c0_1 = arith.constant 0 : index
    %3 = vector.load %arg14[%c0, %c0_1] : memref<8x32xf32, #tpu.memory_space<vmem>>, vector<8x32xf32>
    %4 = arith.truncf %3 : vector<8x32xf32> to vector<8x32xbf16>
    %c0_2 = arith.constant 0 : index
    %c0_3 = arith.constant 0 : index
    %5 = vector.load %arg5[%c0_2, %c0_3] : memref<32x32xbf16, #tpu.memory_space<vmem>>, vector<32x32xbf16>
    %cst = arith.constant dense<0.000000e+00> : vector<8x32xf32>
    %6 = tpu.matmul %4, %5, %cst {dimension_numbers = #tpu.dot_dimension_numbers<[1], [0], [0], [1], [0, 0, 1, 1], [], []>} : vector<8x32xbf16>, vector<32x32xbf16>, vector<8x32xf32> -> vector<8x32xf32>
    %c0_4 = arith.constant 0 : index
    %c0_5 = arith.constant 0 : index
    %c0_6 = arith.constant 0 : index
    %7 = vector.load %arg1[%c0_4, %c0_5, %c0_6] : memref<8x16x32xf32, #tpu.memory_space<vmem>>, vector<8x16x32xf32>
    %8 = vector.shape_cast %6 : vector<8x32xf32> to vector<8x1x32xf32>
    %9 = vector.broadcast %8 : vector<8x1x32xf32> to vector<8x16x32xf32>
    %10 = arith.addf %7, %9 : vector<8x16x32xf32>
    %11 = math.tanh %10 : vector<8x16x32xf32>
    %c0_7 = arith.constant 0 : index
    %c0_8 = arith.constant 0 : index
    %12 = vector.load %arg6[%c0_7, %c0_8] : memref<1x32xf32, #tpu.memory_space<vmem>>, vector<1x32xf32>
    %13 = vector.shape_cast %12 : vector<1x32xf32> to vector<1x1x32xf32>
    %14 = vector.broadcast %13 : vector<1x1x32xf32> to vector<8x16x32xf32>
    %15 = arith.mulf %11, %14 : vector<8x16x32xf32>
    %cst_9 = arith.constant dense<0.000000e+00> : vector<8x16xf32>
    %16 = vector.multi_reduction <add>, %15, %cst_9 [2] : vector<8x16x32xf32> to vector<8x16xf32>
    %cst_10 = arith.constant dense<0xFF800000> : vector<8xf32>
    %17 = vector.multi_reduction <maximumf>, %16, %cst_10 [1] : vector<8x16xf32> to vector<8xf32>
    %18 = vector.shape_cast %17 : vector<8xf32> to vector<8x1xf32>
    %19 = vector.broadcast %18 : vector<8x1xf32> to vector<8x16xf32>
    %20 = arith.subf %16, %19 : vector<8x16xf32>
    %21 = math.exp %20 : vector<8x16xf32>
    %cst_11 = arith.constant dense<0.000000e+00> : vector<8xf32>
    %22 = vector.multi_reduction <add>, %21, %cst_11 [1] : vector<8x16xf32> to vector<8xf32>
    %23 = vector.shape_cast %22 : vector<8xf32> to vector<8x1xf32>
    %24 = tpu.reciprocal %23 {approx = true} : vector<8x1xf32> -> vector<8x1xf32>
    %25 = vector.broadcast %24 : vector<8x1xf32> to vector<8x16xf32>
    %26 = arith.mulf %21, %25 : vector<8x16xf32>
    %27 = vector.shape_cast %26 : vector<8x16xf32> to vector<8x16x1xf32>
    %c0_12 = arith.constant 0 : index
    %c0_13 = arith.constant 0 : index
    %c0_14 = arith.constant 0 : index
    %28 = vector.load %arg2[%c0_12, %c0_13, %c0_14] : memref<8x16x32xf32, #tpu.memory_space<vmem>>, vector<8x16x32xf32>
    %29 = vector.broadcast %27 : vector<8x16x1xf32> to vector<8x16x32xf32>
    %30 = arith.mulf %29, %28 : vector<8x16x32xf32>
    %cst_15 = arith.constant dense<0.000000e+00> : vector<8x32xf32>
    %31 = vector.multi_reduction <add>, %30, %cst_15 [1] : vector<8x16x32xf32> to vector<8x32xf32>
    %c0_16 = arith.constant 0 : index
    %c0_17 = arith.constant 0 : index
    %c0_18 = arith.constant 0 : index
    %32 = vector.load %arg4[%c0_16, %c0_17, %c0_18] : memref<1x8x32xf32, #tpu.memory_space<vmem>>, vector<1x8x32xf32>
    %33 = vector.shape_cast %32 : vector<1x8x32xf32> to vector<8x32xf32>
    %34 = tpu.concatenate %31, %33 in 1 : vector<8x32xf32>, vector<8x32xf32> -> vector<8x64xf32>
    %35 = arith.truncf %34 : vector<8x64xf32> to vector<8x64xbf16>
    %c0_19 = arith.constant 0 : index
    %c0_20 = arith.constant 0 : index
    %36 = vector.load %arg7[%c0_19, %c0_20] : memref<64x128xbf16, #tpu.memory_space<vmem>>, vector<64x128xbf16>
    %cst_21 = arith.constant dense<0.000000e+00> : vector<8x128xf32>
    %37 = tpu.matmul %35, %36, %cst_21 {dimension_numbers = #tpu.dot_dimension_numbers<[1], [0], [0], [1], [0, 0, 1, 1], [], []>} : vector<8x64xbf16>, vector<64x128xbf16>, vector<8x128xf32> -> vector<8x128xf32>
    %c0_22 = arith.constant 0 : index
    %c0_23 = arith.constant 0 : index
    %38 = vector.load %arg8[%c0_22, %c0_23] : memref<1x128xf32, #tpu.memory_space<vmem>>, vector<1x128xf32>
    %39 = vector.broadcast %38 : vector<1x128xf32> to vector<8x128xf32>
    %40 = arith.addf %37, %39 : vector<8x128xf32>
    %41 = vector.extract_strided_slice %40 {offsets = [0, 0], sizes = [8, 32], strides = [1, 1]} : vector<8x128xf32> to vector<8x32xf32>
    %42 = arith.negf %41 : vector<8x32xf32>
    %43 = math.exp %42 : vector<8x32xf32>
    %cst_24 = arith.constant 1.000000e+00 : f32
    %44 = vector.broadcast %cst_24 : f32 to vector<8x32xf32>
    %45 = arith.addf %44, %43 : vector<8x32xf32>
    %46 = arith.divf %44, %45 : vector<8x32xf32>
    %47 = vector.extract_strided_slice %40 {offsets = [0, 32], sizes = [8, 32], strides = [1, 1]} : vector<8x128xf32> to vector<8x32xf32>
    %48 = arith.negf %47 : vector<8x32xf32>
    %49 = math.exp %48 : vector<8x32xf32>
    %cst_25 = arith.constant 1.000000e+00 : f32
    %50 = vector.broadcast %cst_25 : f32 to vector<8x32xf32>
    %51 = arith.addf %50, %49 : vector<8x32xf32>
    %52 = arith.divf %50, %51 : vector<8x32xf32>
    %53 = vector.extract_strided_slice %40 {offsets = [0, 64], sizes = [8, 32], strides = [1, 1]} : vector<8x128xf32> to vector<8x32xf32>
    %c0_26 = arith.constant 0 : index
    %c0_27 = arith.constant 0 : index
    %54 = vector.load %arg9[%c0_26, %c0_27] : memref<1x32xf32, #tpu.memory_space<vmem>>, vector<1x32xf32>
    %55 = vector.broadcast %54 : vector<1x32xf32> to vector<8x32xf32>
    %56 = arith.mulf %46, %55 : vector<8x32xf32>
    %57 = arith.addf %53, %56 : vector<8x32xf32>
    %58 = math.tanh %57 : vector<8x32xf32>
    %cst_28 = arith.constant 1.000000e+00 : f32
    %59 = vector.broadcast %cst_28 : f32 to vector<8x32xf32>
    %60 = arith.subf %59, %52 : vector<8x32xf32>
    %61 = arith.mulf %60, %58 : vector<8x32xf32>
    %c0_29 = arith.constant 0 : index
    %c0_30 = arith.constant 0 : index
    %62 = vector.load %arg10[%c0_29, %c0_30] : memref<32x128xf32, #tpu.memory_space<vmem>>, vector<32x128xf32>
    %cst_31 = arith.constant dense<0.000000e+00> : vector<8x128xf32>
    %63 = tpu.matmul %61, %62, %cst_31 {dimension_numbers = #tpu.dot_dimension_numbers<[1], [0], [0], [1], [0, 0, 1, 1], [], []>} : vector<8x32xf32>, vector<32x128xf32>, vector<8x128xf32> -> vector<8x128xf32>
    %c0_32 = arith.constant 0 : index
    %c0_33 = arith.constant 0 : index
    %64 = vector.load %arg11[%c0_32, %c0_33] : memref<1x128xf32, #tpu.memory_space<vmem>>, vector<1x128xf32>
    %65 = vector.broadcast %64 : vector<1x128xf32> to vector<8x128xf32>
    %66 = arith.addf %63, %65 : vector<8x128xf32>
    %c0_34 = arith.constant 0 : index
    %c0_35 = arith.constant 0 : index
    %c0_36 = arith.constant 0 : index
    %67 = vector.load %arg12[%c0_34, %c0_35, %c0_36] : memref<1x8x128xf32, #tpu.memory_space<vmem>>, vector<1x8x128xf32>
    %68 = vector.shape_cast %67 : vector<1x8x128xf32> to vector<8x128xf32>
    %69 = vector.shape_cast %66 : vector<8x128xf32> to vector<1x8x128xf32>
    tpu.vector_store %arg12[%c0_34, %c0_35, %c0_36], %69 {strides = array<i32>} : memref<1x8x128xf32, #tpu.memory_space<vmem>>, vector<1x8x128xf32>,
    %cst_37 = arith.constant 0.000000e+00 : f32
    %70 = vector.broadcast %cst_37 : f32 to vector<8x80xf32>
    %71 = tpu.concatenate %61, %26, %70 in 1 : vector<8x32xf32>, vector<8x16xf32>, vector<8x80xf32> -> vector<8x128xf32>
    %c0_38 = arith.constant 0 : index
    %c0_39 = arith.constant 0 : index
    %c0_40 = arith.constant 0 : index
    %72 = vector.load %arg13[%c0_38, %c0_39, %c0_40] : memref<1x8x128xf32, #tpu.memory_space<vmem>>, vector<1x8x128xf32>
    %73 = vector.shape_cast %72 : vector<1x8x128xf32> to vector<8x128xf32>
    %74 = vector.shape_cast %71 : vector<8x128xf32> to vector<1x8x128xf32>
    tpu.vector_store %arg13[%c0_38, %c0_39, %c0_40], %74 {strides = array<i32>} : memref<1x8x128xf32, #tpu.memory_space<vmem>>, vector<1x8x128xf32>,
    %c0_41 = arith.constant 0 : index
    %c0_42 = arith.constant 0 : index
    %75 = vector.load %arg14[%c0_41, %c0_42] : memref<8x32xf32, #tpu.memory_space<vmem>>, vector<8x32xf32>
    tpu.vector_store %arg14[%c0_41, %c0_42], %61 {strides = array<i32>} : memref<8x32xf32, #tpu.memory_space<vmem>>, vector<8x32xf32>,
    return
  }
  func.func @transform_0(%arg0: i32) -> (i32, i32, i32) {
    %c0_i32 = arith.constant 0 : i32
    %c0_i32_0 = arith.constant 0 : i32
    %c0_i32_1 = arith.constant 0 : i32
    %c0_i32_2 = arith.constant 0 : i32
    return %c0_i32, %c0_i32_0, %c0_i32_1 : i32, i32, i32
  }
  func.func @transform_1(%arg0: i32) -> (i32, i32, i32) {
    %c0_i32 = arith.constant 0 : i32
    %c0_i32_0 = arith.constant 0 : i32
    %c0_i32_1 = arith.constant 0 : i32
    %c0_i32_2 = arith.constant 0 : i32
    return %c0_i32, %c0_i32_0, %c0_i32_1 : i32, i32, i32
  }
  func.func @transform_2(%arg0: i32) -> (i32, i32) {
    %c0_i32 = arith.constant 0 : i32
    %c0_i32_0 = arith.constant 0 : i32
    %c0_i32_1 = arith.constant 0 : i32
    return %c0_i32, %c0_i32_0 : i32, i32
  }
  func.func @transform_3(%arg0: i32) -> (i32, i32, i32) {
    %c0_i32 = arith.constant 0 : i32
    %c0_i32_0 = arith.constant 0 : i32
    %c0_i32_1 = arith.constant 0 : i32
    return %arg0, %c0_i32, %c0_i32_0 : i32, i32, i32
  }
  func.func @transform_4(%arg0: i32) -> (i32, i32) {
    %c0_i32 = arith.constant 0 : i32
    %c0_i32_0 = arith.constant 0 : i32
    %c0_i32_1 = arith.constant 0 : i32
    return %c0_i32, %c0_i32_0 : i32, i32
  }
  func.func @transform_5(%arg0: i32) -> (i32, i32) {
    %c0_i32 = arith.constant 0 : i32
    %c0_i32_0 = arith.constant 0 : i32
    %c0_i32_1 = arith.constant 0 : i32
    return %c0_i32, %c0_i32_0 : i32, i32
  }
  func.func @transform_6(%arg0: i32) -> (i32, i32) {
    %c0_i32 = arith.constant 0 : i32
    %c0_i32_0 = arith.constant 0 : i32
    %c0_i32_1 = arith.constant 0 : i32
    return %c0_i32, %c0_i32_0 : i32, i32
  }
  func.func @transform_7(%arg0: i32) -> (i32, i32) {
    %c0_i32 = arith.constant 0 : i32
    %c0_i32_0 = arith.constant 0 : i32
    %c0_i32_1 = arith.constant 0 : i32
    return %c0_i32, %c0_i32_0 : i32, i32
  }
  func.func @transform_8(%arg0: i32) -> (i32, i32) {
    %c0_i32 = arith.constant 0 : i32
    %c0_i32_0 = arith.constant 0 : i32
    %c0_i32_1 = arith.constant 0 : i32
    return %c0_i32, %c0_i32_0 : i32, i32
  }
  func.func @transform_9(%arg0: i32) -> (i32, i32) {
    %c0_i32 = arith.constant 0 : i32
    %c0_i32_0 = arith.constant 0 : i32
    %c0_i32_1 = arith.constant 0 : i32
    return %c0_i32, %c0_i32_0 : i32, i32
  }
  func.func @transform_10(%arg0: i32) -> (i32, i32) {
    %c0_i32 = arith.constant 0 : i32
    %c0_i32_0 = arith.constant 0 : i32
    %c0_i32_1 = arith.constant 0 : i32
    return %c0_i32, %c0_i32_0 : i32, i32
  }
  func.func @transform_11(%arg0: i32) -> (i32, i32, i32) {
    %c0_i32 = arith.constant 0 : i32
    %c0_i32_0 = arith.constant 0 : i32
    %c0_i32_1 = arith.constant 0 : i32
    return %arg0, %c0_i32, %c0_i32_0 : i32, i32, i32
  }
  func.func @transform_12(%arg0: i32) -> (i32, i32, i32) {
    %c0_i32 = arith.constant 0 : i32
    %c0_i32_0 = arith.constant 0 : i32
    %c0_i32_1 = arith.constant 0 : i32
    return %arg0, %c0_i32, %c0_i32_0 : i32, i32, i32
  }
}

</mosaic_0001>

<bundles_post_ra>
// kernel: tpu_custom_call.1
= control target key start
LH: loop header
LB: loop body
LE: loop exit
PB: predicated region body
PF: predicated region fallthrough
CT: control target
= control target key end

     0   :  { %18 = vsyncpa [#allocation4], 0  ;;  %s2209_s0 = inlined_call_operand.hbm [shape: f32[8,16,32], index: 0, kind: input, shape index: {}]   ;;  %s2210_s1 = inlined_call_operand.hbm [shape: f32[8,16,32], index: 1, kind: input, shape index: {}]   ;;  %s2211_s2 = inlined_call_operand.hbm [shape: f32[8,32], index: 2, kind: input, shape index: {}]   ;;  %s2212_s3 = inlined_call_operand.hbm [shape: f32[1,8,32], index: 3, kind: input, shape index: {}]   ;;  %s2213_s4 = inlined_call_operand.hbm [shape: bf16[32,32], index: 4, kind: input, shape index: {}]   ;;  %s2214_s5 = inlined_call_operand.vmem [shape: f32[1,32], index: 5, kind: input, shape index: {}]   ;;  %s2215_s6 = inlined_call_operand.hbm [shape: bf16[64,128], index: 6, kind: input, shape index: {}]   ;;  %s2216_s7 = inlined_call_operand.vmem [shape: f32[1,128], index: 7, kind: input, shape index: {}]   ;;  %s2217_s8 = inlined_call_operand.vmem [shape: f32[1,32], index: 8, kind: input, shape index: {}]   ;;  %s2218_s9 = inlined_call_operand.hbm [shape: f32[32,128], index: 9, kind: input, shape index: {}]   ;;  %s2219_s10 = inlined_call_operand.vmem [shape: f32[1,128], index: 10, kind: input, shape index: {}]   ;;  %s2220_s11 = inlined_call_operand.hbm [shape: f32[1,8,128], index: 11, kind: output, shape index: {0}]   ;;  %s2221_s12 = inlined_call_operand.hbm [shape: f32[1,8,128], index: 12, kind: output, shape index: {1}]  }
   0x1   :  { %19 = vsyncpa [#allocation7], 0 }
   0x2   :  { %20 = vsyncpa [#allocation10], 0 }
   0x3   :  { %21 = vsyncpa [#allocation13], 0 }
   0x4   :  { %22 = vsyncpa [#allocation5], 0 }
   0x5   :  { %23 = vsyncpa [#allocation17], 0  ;;  %s1690_s21 = smov [#allocation6]   ;;  %s1691_s23 = smov [#allocation9]  }
   0x6   :  { %s41_s22 = sshll.u32 %s1690_s21, 4  ;;  %s64_s24 = sshll.u32 %s1691_s23, 4  ;;  %s42_s22 = int_to_ptr.vmem [resolvable:$true] %s41_s22  ;;  %s65_s24 = int_to_ptr.vmem [resolvable:$true] %s64_s24 }
   0x7   :  { %s1506_s25 = scalar_lea.vmem %s42_s22, 2048  ;;  %p1511_p1 = scmp.lt.s32.totalorder %s42_s22, %s42_s22 }
   0x8   :  { %p1507_p0 = scmp.ne.s32.totalorder %s42_s22, %s1506_s25  ;;  %p1512_p2 = scmp.lt.s32.totalorder %s1506_s25, %s1506_s25 }
   0xa   :  { %p1513_p3 = por %p1512_p2, %p1511_p1 }
   0xc   :  { %p1514_p4 = pnand %p1513_p3, %p1507_p0 }
   0xe   :  { %1517 = shalt.err (!%p1514_p4)
}
   0xf   :  { %s1692_s26 = smov 128   ;;  %s1693_s27 = smov 8  }
  0x10   :  { %47 = dma.hbm_to_vmem [thread:$0]  %s2210_s1, 2048, %s42_s22, [#allocation7], %s1692_s26, %s1692_s26, %s1693_s27  }
  0x11   :  { %s1526_s30 = scalar_lea.vmem %s65_s24, 128  ;;  %p1531_p6 = scmp.lt.s32.totalorder %s65_s24, %s65_s24 }
  0x12   :  { %p1527_p5 = scmp.ne.s32.totalorder %s65_s24, %s1526_s30  ;;  %p1532_p7 = scmp.lt.s32.totalorder %s1526_s30, %s1526_s30 }
  0x14   :  { %p1533_p8 = por %p1532_p7, %p1531_p6 }
  0x16   :  { %p1534_p9 = pnand %p1533_p8, %p1527_p5 }
  0x18   :  { %1537 = shalt.err (!%p1534_p9)
}
  0x19   :  { %67 = dma.hbm_to_vmem [thread:$0]  %s2212_s3, 128, %s65_s24, [#allocation10]  }
  0x1a   :  { %s1694_s15 = smov [#allocation12]   ;;  %s1695_s17 = smov [#allocation3]  }
  0x1b   :  { %s87_s16 = sshll.u32 %s1694_s15, 4  ;;  %s29_s18 = sshll.u32 %s1695_s17, 4  ;;  %s88_s16 = int_to_ptr.vmem [resolvable:$true] %s87_s16  ;;  %s30_s18 = int_to_ptr.vmem [resolvable:$true] %s29_s18 }
  0x1c   :  { %s1546_s19 = scalar_lea.vmem %s88_s16, 512  ;;  %p1551_p11 = scmp.lt.s32.totalorder %s88_s16, %s88_s16 }
  0x1d   :  { %p1547_p10 = scmp.ne.s32.totalorder %s88_s16, %s1546_s19  ;;  %p1552_p12 = scmp.lt.s32.totalorder %s1546_s19, %s1546_s19 }
  0x1f   :  { %p1553_p13 = por %p1552_p12, %p1551_p11 }
  0x21   :  { %p1554_p0 = pnand %p1553_p13, %p1547_p10 }
  0x23   :  { %1557 = shalt.err (!%p1554_p0)
}
  0x24   :  { %s1696_s1 = smov 64   ;;  %s1697_s20 = smov 4  }
  0x25   :  { %93 = dma.hbm_to_vmem [thread:$0]  %s2215_s6, 512, %s88_s16, [#allocation13], %s1696_s1, %s1696_s1, %s1697_s20  }
  0x26   :  { %s1566_s22 = scalar_lea.vmem %s30_s18, 2048  ;;  %p1571_p2 = scmp.lt.s32.totalorder %s30_s18, %s30_s18 }
  0x27   :  { %p1567_p1 = scmp.ne.s32.totalorder %s30_s18, %s1566_s22  ;;  %p1572_p3 = scmp.lt.s32.totalorder %s1566_s22, %s1566_s22 }
  0x29   :  { %p1573_p4 = por %p1572_p3, %p1571_p2 }
  0x2b   :  { %p1574_p5 = pnand %p1573_p4, %p1567_p1 }
  0x2d   :  { %1577 = shalt.err (!%p1574_p5)
}
  0x2e   :  { %35 = dma.hbm_to_vmem [thread:$0]  %s2209_s0, 2048, %s30_s18, [#allocation4], %s1692_s26, %s1692_s26, %s1693_s27  }
  0x2f   :  { %s1698_s25 = smov [#allocation8]   ;;  %s1699_s29 = smov [#allocation11]  }
  0x30   :  { %s54_s28 = sshll.u32 %s1698_s25, 4  ;;  %s73_s30 = sshll.u32 %s1699_s29, 4  ;;  %s55_s28 = int_to_ptr.vmem [resolvable:$true] %s54_s28  ;;  %s74_s30 = int_to_ptr.vmem [resolvable:$true] %s73_s30 }
  0x31   :  { %s1586_s6 = scalar_lea.vmem %s55_s28, 128  ;;  %p1591_p7 = scmp.lt.s32.totalorder %s55_s28, %s55_s28 }
  0x32   :  { %p1587_p6 = scmp.ne.s32.totalorder %s55_s28, %s1586_s6  ;;  %p1592_p8 = scmp.lt.s32.totalorder %s1586_s6, %s1586_s6 }
  0x34   :  { %p1593_p9 = por %p1592_p8, %p1591_p7 }
  0x36   :  { %p1594_p10 = pnand %p1593_p9, %p1587_p6 }
  0x38   :  { %1597 = shalt.err (!%p1594_p10)
}
  0x39   :  { %57 = dma.hbm_to_vmem [thread:$0]  %s2211_s2, 128, %s55_s28, [#allocation7]  }
  0x3a   :  { %s1606_s15 = scalar_lea.vmem %s74_s30, 256  ;;  %p1611_p12 = scmp.lt.s32.totalorder %s74_s30, %s74_s30 }
  0x3b   :  { %p1607_p11 = scmp.ne.s32.totalorder %s74_s30, %s1606_s15  ;;  %p1612_p13 = scmp.lt.s32.totalorder %s1606_s15, %s1606_s15 }
  0x3d   :  { %p1613_p0 = por %p1612_p13, %p1611_p12 }
  0x3f   :  { %p1614_p1 = pnand %p1613_p0, %p1607_p11 }
  0x41   :  { %1617 = shalt.err (!%p1614_p1)
}
  0x42   :  { %79 = dma.hbm_to_vmem [thread:$0]  %s2213_s4, 256, %s74_s30, [#allocation10], %s1696_s1, %s1696_s1, %s1697_s20  }
  0x43   :  { %s1700_s17 = smov [#allocation14]  }
  0x44   :  { %s103_s18 = sshll.u32 %s1700_s17, 4  ;;  %s104_s18 = int_to_ptr.vmem [resolvable:$true] %s103_s18 }
  0x45   :  { %s1626_s19 = scalar_lea.vmem %s104_s18, 512  ;;  %p1631_p3 = scmp.lt.s32.totalorder %s104_s18, %s104_s18 }
  0x46   :  { %p1627_p2 = scmp.ne.s32.totalorder %s104_s18, %s1626_s19  ;;  %p1632_p4 = scmp.lt.s32.totalorder %s1626_s19, %s1626_s19 }
  0x48   :  { %p1633_p5 = por %p1632_p4, %p1631_p3 }
  0x4a   :  { %p1634_p6 = pnand %p1633_p5, %p1627_p2 }
  0x4c   :  { %1637 = shalt.err (!%p1634_p6)
}
  0x4d   :  { %109 = dma.hbm_to_vmem [thread:$0]  %s2218_s9, 512, %s104_s18, [#allocation13], %s1692_s26, %s1692_s26, %s1693_s27  }
  0x4e   :  { %1678 = dma.done.wait [#allocation4], 2048  }
  0x4f   :  { %1679 = vsyncadd [#allocation4], 4294965248 }
  0x50   :  { %1680 = dma.done.wait [#allocation7], 2176  }
  0x51   :  { %1681 = vsyncadd [#allocation7], 4294965120 }
  0x52   :  { %1682 = dma.done.wait [#allocation10], 384  }
  0x53   :  { %1683 = vsyncadd [#allocation10], 4294966912 }
  0x54   :  { %1684 = dma.done.wait [#allocation13], 1024  }
  0x55   :  { %1685 = vsyncadd [#allocation13], 4294966272  ;;  %v1701_v0 = vmov 0.0   ;;  %vm1702_vm0 = vmmov 0   ;;  %v1420_v1 = vld [vmem:[#allocation11 + $0x8] sm:$0xff]   ;;  %vm139_vm1 = vcmask 261120   ;;  %v224_v8 = vlaneseq }
  0x56   :  { %1368 = vmatprep.subr.bf16.mxu0 %v1701_v0  ;;  %1372 = vmatprep.mubr.msk.bf16.mxu0 %vm1702_vm0, %v1701_v0  ;;  %v1421_v2 = vld [vmem:[#allocation11] sm:$0xff]   ;;  %v138_v3 = vld [vmem:[#allocation8] sm:$0xff]  ;;  %v1703_v6 = vmov 1966171168   ;;  %v204_v26 = vld [vmem:[#allocation3 + $0x8] sm:$0xff]  ;;  %vm439_vm2 = vcmask 130112  }
  0x57   :  { %1376 = vmatprep.subr.bf16.mxu1 %v1701_v0  ;;  %1384 = vmatprep.mubr.msk.bf16.mxu1 %vm1702_vm0, %v1701_v0  ;;  %140 = vst.msk [vmem:[#allocation2] sm:$0xff] %vm139_vm1, %v138_v3  ;;  %v222_v7 = vunpack.c.l.s4 %v1703_v6  ;;  %v1823_v10 = vshrl.u32 %v224_v8, 7  ;;  %v203_v23 = vld [vmem:[#allocation3] sm:$0xff]  ;;  %v205_v28 = vld [vmem:[#allocation3 + $0x10] sm:$0xff]  ;;  %v206_v29 = vld [vmem:[#allocation3 + $0x18] sm:$0xff]  ;;  %vm504_vm3 = vcmask 1041409  }
  0x58   :  { %1369 = vmatpush3.bf16.msra.mxu0 %v1420_v1  ;;  %v207_v33 = vld [vmem:[#allocation3 + $0x20] sm:$0xff]  ;;  %v208_v36 = vld [vmem:[#allocation3 + $0x28] sm:$0xff]  ;;  %v209_v48 = vld [vmem:[#allocation3 + $0x30] sm:$0xff]  ;;  %vm506_vm4 = vcmask 1042434   ;;  %vm508_vm5 = vcmask 1043459   ;;  %vm510_vm6 = vcmask 1044484  }
  0x59   :  { %1370 = vmatprep.subr.bf16.mxu0 %v1701_v0  ;;  %v223_v9 = vunpack.c.0.s8 %v222_v7  ;;  %v1827_v15 = vsub.s32 0, %v1823_v10  ;;  %v211_v42 = vld [vmem:[#allocation3 + $0x40] sm:$0xff]  ;;  %v212_v44 = vld [vmem:[#allocation3 + $0x48] sm:$0xff]  ;;  %v210_v50 = vld [vmem:[#allocation3 + $0x38] sm:$0xff]  ;;  %vm512_vm7 = vcmask 1045509   ;;  %vm514_vm8 = vcmask 1046534  }
  0x5a   :  { %v213_v54 = vld [vmem:[#allocation3 + $0x50] sm:$0xff]  ;;  %v214_v56 = vld [vmem:[#allocation3 + $0x58] sm:$0xff]  ;;  %v215_v60 = vld [vmem:[#allocation3 + $0x60] sm:$0xff]  ;;  %vm516_vm9 = vcmask 1047559   ;;  %vm519_vm10 = vcmask 130048   ;;  %vm1231_vm11 = vcmask 392512  }
  0x5b   :  { %v226_v11 = vsub.s32 %v223_v9, %v1823_v10  ;;  %v1839_v59 = vld [vmem:[%s2214_s5] ss:$0 sm:$0xff]  ;;  %s1705_s5 = smov 32   ;;  %vm1063_vm12 = vcmask 523264   ;;  %vm1305_vm13 = vcmask 392192  }
  0x5c   :  { %1371 = vmatpush3.bf16.msra.mxu0 %v1421_v2 }
  0x5d   :  { %1388 = vmatprep.subr.mxu0 %v1701_v0 }
  0x5e   :  { %v141_v4 = vld [vmem:[#allocation2] sm:$0xff] }
  0x5f   :  { %v142_v5 = vpack.c.bf16 %v141_v4, %v141_v4  ;;  %v216_v4 = vld [vmem:[#allocation3 + $0x68] sm:$0xff] }
  0x61   :  { %1373 = vmatmul.mubr.msk.bf16.vlgmr.msra.gmra.mxu0 %vm139_vm1, %v142_v5 }
  0x62   :  { %1396 = vmatprep.mubr.msk.f32.mxu0 %vm1702_vm0, %v1701_v0 }
 0x121   :  { %v197_v12 = vpop.f32.mrf.mxu0 }
 0x122   :  { %v220_v13 = vcombine.high %v197_v12, %v197_v12  ;;  %v227_v14 = vrot.slane %v197_v12, %v226_v11 }
 0x123   :  { %v1374_v16 = vpop.f32.mrf.mxu0 }
 0x124   :  { %v235_v17 = vcombine.high %v227_v14, %v227_v14  ;;  %v243_v18 = vrot.slane %v227_v14, %v226_v11  ;;  %v234_v20 = vrot.slane %v220_v13, %v226_v11  ;;  %v217_v14 = vld [vmem:[#allocation3 + $0x70] sm:$0xff] }
 0x125   :  { %v200_v19 = vpop.f32.mrf.mxu0 }
 0x126   :  { %v257_v21 = vrot.slane %v235_v17, %v226_v11  ;;  %v265_v22 = vcombine.high %v243_v18, %v243_v18  ;;  %v272_v24 = vrot.slane %v243_v18, %v1827_v15  ;;  %v250_v30 = vrot.slane %v234_v20, %v226_v11 }
 0x127   :  { %v1375_v25 = vpop.f32.mrf.mxu0  ;;  %v236_v37 = vcombine.high %v234_v20, %v234_v20  ;;  %v218_v20 = vld [vmem:[#allocation3 + $0x78] sm:$0xff] }
 0x128   :  { %v276_v27 = vrot.slane %v257_v21, %v1827_v15  ;;  %v280_v31 = vrot.slane %v265_v22, %v1827_v15  ;;  %v309_v32 = vadd.f32 %v272_v24, %v203_v23  ;;  %v310_v34 = vadd.f32 %v272_v24, %v204_v26 }
 0x129   :  { %v267_v39 = vcombine.high %v257_v21, %v257_v21  ;;  %v288_v40 = vrot.slane %v250_v30, %v1827_v15  ;;  %v264_v45 = vrot.slane %v236_v37, %v226_v11  ;;  %v266_v51 = vcombine.high %v250_v30, %v250_v30 }
 0x12a   :  { %v311_v35 = vadd.f32 %v276_v27, %v205_v28  ;;  %v312_v38 = vadd.f32 %v276_v27, %v206_v29  ;;  %v313_v41 = vadd.f32 %v280_v31, %v207_v33  ;;  %1426 = vtanh.f32 %v309_v32 }
 0x12b   :  { %1428 = vtanh.f32 %v310_v34  ;;  %v314_v43 = vadd.f32 %v280_v31, %v208_v36  ;;  %v284_v46 = vrot.slane %v267_v39, %v1827_v15  ;;  %v317_v47 = vadd.f32 %v288_v40, %v211_v42 }
 0x12c   :  { %1430 = vtanh.f32 %v311_v35  ;;  %v318_v49 = vadd.f32 %v288_v40, %v212_v44  ;;  %v292_v52 = vrot.slane %v264_v45, %v1827_v15  ;;  %v268_v57 = vcombine.high %v264_v45, %v264_v45 }
 0x12d   :  { %1432 = vtanh.f32 %v312_v38  ;;  %v315_v53 = vadd.f32 %v284_v46, %v209_v48  ;;  %v316_v55 = vadd.f32 %v284_v46, %v210_v50  ;;  %v296_v58 = vrot.slane %v266_v51, %v1827_v15 }
 0x12e   :  { %1434 = vtanh.f32 %v313_v41  ;;  %v319_v61 = vadd.f32 %v292_v52, %v213_v54  ;;  %v320_v1 = vadd.f32 %v292_v52, %v214_v56  ;;  %v300_v5 = vrot.slane %v268_v57, %v1827_v15 }
 0x12f   :  { %1436 = vtanh.f32 %v314_v43  ;;  %v321_v6 = vadd.f32 %v296_v58, %v215_v60  ;;  %v322_v16 = vadd.f32 %v296_v58, %v216_v4 }
 0x130   :  { %1438 = vtanh.f32 %v317_v47  ;;  %v323_v21 = vadd.f32 %v300_v5, %v217_v14  ;;  %v324_v25 = vadd.f32 %v300_v5, %v218_v20 }
 0x131   :  { %1440 = vtanh.f32 %v318_v49 }
 0x132   :  { %1442 = vtanh.f32 %v315_v53 }
 0x133   :  { %1444 = vtanh.f32 %v316_v55 }
 0x134   :  { %1446 = vtanh.f32 %v319_v61 }
 0x135   :  { %1448 = vtanh.f32 %v320_v1 }
 0x136   :  { %1450 = vtanh.f32 %v321_v6 }
 0x137   :  { %v1427_v62 = vpop.eup %1426  ;;  %1452 = vtanh.f32 %v322_v16 }
 0x138   :  { %v1429_v63 = vpop.eup %1428  ;;  %v348_v2 = vmul.f32 %v1427_v62, %v1839_v59  ;;  %1454 = vtanh.f32 %v323_v21 }
 0x139   :  { %v1431_v3 = vpop.eup %1430  ;;  %v349_v12 = vmul.f32 %v1429_v63, %v1839_v59  ;;  %1456 = vtanh.f32 %v324_v25 }
 0x13a   :  { %v1433_v7 = vpop.eup %1432  ;;  %v364_v9 = vsel %vm139_vm1, %v348_v2, 0.0  ;;  %v350_v11 = vmul.f32 %v1431_v3, %v1839_v59 }
 0x13b   :  { %v1435_v13 = vpop.eup %1434  ;;  %365 = vadd.xlane.f32.xlu0 %v364_v9  ;;  %v351_v18 = vmul.f32 %v1433_v7, %v1839_v59  ;;  %v367_v22 = vsel %vm139_vm1, %v349_v12, 0.0 }
 0x13c   :  { %v370_v17 = vsel %vm139_vm1, %v350_v11, 0.0  ;;  %v1437_v19 = vpop.eup %1436  ;;  %v352_v23 = vmul.f32 %v1435_v13, %v1839_v59 }
 0x13d   :  { %371 = vadd.xlane.f32.xlu1 %v370_v17  ;;  %v1439_v24 = vpop.eup %1438  ;;  %v373_v26 = vsel %vm139_vm1, %v351_v18, 0.0  ;;  %v353_v27 = vmul.f32 %v1437_v19, %v1839_v59 }
 0x13e   :  { %v1441_v28 = vpop.eup %1440  ;;  %v376_v29 = vsel %vm139_vm1, %v352_v23, 0.0  ;;  %v356_v30 = vmul.f32 %v1439_v24, %v1839_v59 }
 0x13f   :  { %368 = vadd.xlane.f32.xlu0 %v367_v22  ;;  %v1443_v31 = vpop.eup %1442  ;;  %v379_v32 = vsel %vm139_vm1, %v353_v27, 0.0  ;;  %v357_v33 = vmul.f32 %v1441_v28, %v1839_v59 }
 0x140   :  { %v1445_v34 = vpop.eup %1444  ;;  %v388_v35 = vsel %vm139_vm1, %v356_v30, 0.0  ;;  %v354_v36 = vmul.f32 %v1443_v31, %v1839_v59 }
 0x141   :  { %374 = vadd.xlane.f32.xlu1 %v373_v26  ;;  %v1447_v37 = vpop.eup %1446  ;;  %v391_v38 = vsel %vm139_vm1, %v357_v33, 0.0  ;;  %v355_v39 = vmul.f32 %v1445_v34, %v1839_v59 }
 0x142   :  { %v1449_v40 = vpop.eup %1448  ;;  %v382_v41 = vsel %vm139_vm1, %v354_v36, 0.0  ;;  %v358_v42 = vmul.f32 %v1447_v37, %v1839_v59 }
 0x143   :  { %377 = vadd.xlane.f32.xlu0 %v376_v29  ;;  %v1451_v43 = vpop.eup %1450  ;;  %v385_v44 = vsel %vm139_vm1, %v355_v39, 0.0  ;;  %v359_v45 = vmul.f32 %v1449_v40, %v1839_v59 }
 0x144   :  { %v1453_v46 = vpop.eup %1452  ;;  %v394_v47 = vsel %vm139_vm1, %v358_v42, 0.0  ;;  %v360_v48 = vmul.f32 %v1451_v43, %v1839_v59 }
 0x145   :  { %380 = vadd.xlane.f32.xlu1 %v379_v32  ;;  %v1455_v49 = vpop.eup %1454  ;;  %v397_v50 = vsel %vm139_vm1, %v359_v45, 0.0  ;;  %v361_v51 = vmul.f32 %v1453_v46, %v1839_v59 }
 0x146   :  { %v1457_v52 = vpop.eup %1456  ;;  %v400_v53 = vsel %vm139_vm1, %v360_v48, 0.0  ;;  %v362_v54 = vmul.f32 %v1455_v49, %v1839_v59 }
 0x147   :  { %389 = vadd.xlane.f32.xlu0 %v388_v35  ;;  %v403_v55 = vsel %vm139_vm1, %v361_v51, 0.0  ;;  %v363_v56 = vmul.f32 %v1457_v52, %v1839_v59  ;;  %v1887_v59 = vand.u32 127, %v224_v8  ;;  %v530_v51 = vsub.s32 1, %v1823_v10 }
 0x148   :  { %v406_v57 = vsel %vm139_vm1, %v362_v54, 0.0 }
 0x149   :  { %392 = vadd.xlane.f32.xlu1 %v391_v38  ;;  %v409_v58 = vsel %vm139_vm1, %v363_v56, 0.0  ;;  %v434_v4 = vadd.s32 4294967288, %v1887_v59  ;;  %v1903_v11 = vsub.s32 %v1887_v59, %v1823_v10 }
 0x14b   :  { %383 = vadd.xlane.f32.xlu0 %v382_v41  ;;  %v1897_v7 = vsub.s32 %v434_v4, %v1823_v10 }
 0x14d   :  { %386 = vadd.xlane.f32.xlu1 %v385_v44 }
 0x14f   :  { %395 = vadd.xlane.f32.xlu0 %v394_v47 }
 0x151   :  { %398 = vadd.xlane.f32.xlu1 %v397_v50  ;;  %v1704_v50 = vmov 0  }
 0x152   :  { %1419 = vset.pattern.permute.xlu0 %v1704_v50  ;;  %1418 = vset.pattern.permute.xlu1 %v1704_v50 }
 0x153   :  { %401 = vadd.xlane.f32.xlu0 %v400_v53 }
 0x155   :  { %404 = vadd.xlane.f32.xlu1 %v403_v55  ;;  %v546_v55 = vsub.s32 5, %v1823_v10 }
 0x157   :  { %407 = vadd.xlane.f32.xlu0 %v406_v57 }
 0x159   :  { %410 = vadd.xlane.f32.xlu1 %v409_v58  ;;  %v534_v58 = vsub.s32 2, %v1823_v10 }
 0x1c4   :  { %v1874_v60 = vpop.xlane.xlu0 %365 }
 0x1c5   :  { %v433_v20 = vrot.slane %v1874_v60, %v1903_v11 }
 0x1c6   :  { %v1876_v61 = vpop.xlane.xlu1 %371 }
 0x1c7   :  { %v444_v14 = vrot.slane %v1876_v61, %v1903_v11 }
 0x1c8   :  { %v1878_v62 = vpop.xlane.xlu0 %368 }
 0x1c9   :  { %v438_v16 = vrot.slane %v1878_v62, %v1897_v7 }
 0x1ca   :  { %v1880_v63 = vpop.xlane.xlu1 %374 }
 0x1cb   :  { %v448_v8 = vrot.slane %v1880_v63, %v1897_v7  ;;  %v440_v25 = vsel %vm439_vm2, %v438_v16, %v433_v20 }
 0x1cc   :  { %v1882_v1 = vpop.xlane.xlu0 %377 }
 0x1cd   :  { %v453_v18 = vrot.slane %v1882_v1, %v1903_v11  ;;  %v449_v21 = vsel %vm439_vm2, %v448_v8, %v444_v14  ;;  %v550_v8 = vsub.s32 6, %v1823_v10 }
 0x1ce   :  { %v1884_v2 = vpop.xlane.xlu1 %380  ;;  %v505_v28 = vsel %vm504_vm3, %v449_v21, %v440_v25  ;;  %v538_v21 = vsub.s32 3, %v1823_v10 }
 0x1cf   :  { %v457_v12 = vrot.slane %v1884_v2, %v1897_v7 }
 0x1d0   :  { %v1889_v3 = vpop.xlane.xlu0 %389 }
 0x1d1   :  { %v458_v23 = vsel %vm439_vm2, %v457_v12, %v453_v18  ;;  %v471_v34 = vrot.slane %v1889_v3, %v1903_v11 }
 0x1d2   :  { %v1892_v5 = vpop.xlane.xlu1 %392  ;;  %v507_v31 = vsel %vm506_vm4, %v458_v23, %v505_v28 }
 0x1d3   :  { %v475_v29 = vrot.slane %v1892_v5, %v1897_v7 }
 0x1d4   :  { %v1894_v6 = vpop.xlane.xlu0 %383 }
 0x1d5   :  { %v462_v22 = vrot.slane %v1894_v6, %v1903_v11  ;;  %v476_v39 = vsel %vm439_vm2, %v475_v29, %v471_v34 }
 0x1d6   :  { %v1899_v9 = vpop.xlane.xlu1 %386 }
 0x1d7   :  { %v466_v17 = vrot.slane %v1899_v9, %v1897_v7 }
 0x1d8   :  { %v1909_v13 = vpop.xlane.xlu0 %395 }
 0x1d9   :  { %v467_v26 = vsel %vm439_vm2, %v466_v17, %v462_v22  ;;  %v480_v32 = vrot.slane %v1909_v13, %v1903_v11 }
 0x1da   :  { %v1919_v19 = vpop.xlane.xlu1 %398  ;;  %v509_v35 = vsel %vm508_vm5, %v467_v26, %v507_v31 }
 0x1db   :  { %v484_v27 = vrot.slane %v1919_v19, %v1897_v7  ;;  %v511_v44 = vsel %vm510_vm6, %v476_v39, %v509_v35 }
 0x1dc   :  { %v1927_v24 = vpop.xlane.xlu0 %401 }
 0x1dd   :  { %v489_v36 = vrot.slane %v1927_v24, %v1903_v11  ;;  %v485_v38 = vsel %vm439_vm2, %v484_v27, %v480_v32 }
 0x1de   :  { %v1936_v30 = vpop.xlane.xlu1 %404  ;;  %v513_v45 = vsel %vm512_vm7, %v485_v38, %v511_v44 }
 0x1df   :  { %v493_v33 = vrot.slane %v1936_v30, %v1897_v7 }
 0x1e0   :  { %v1948_v37 = vpop.xlane.xlu0 %407 }
 0x1e1   :  { %v494_v41 = vsel %vm439_vm2, %v493_v33, %v489_v36  ;;  %v498_v42 = vrot.slane %v1948_v37, %v1903_v11 }
 0x1e2   :  { %v1952_v40 = vpop.xlane.xlu1 %410  ;;  %v515_v47 = vsel %vm514_vm8, %v494_v41, %v513_v45 }
 0x1e3   :  { %v502_v43 = vrot.slane %v1952_v40, %v1897_v7 }
 0x1e5   :  { %v503_v46 = vsel %vm439_vm2, %v502_v43, %v498_v42 }
 0x1e6   :  { %v517_v48 = vsel %vm516_vm9, %v503_v46, %v515_v47 }
 0x1e7   :  { %v520_v49 = vsel %vm519_vm10, %v517_v48, -inf }
 0x1e8   :  { %521 = vmax.xlane.f32.xlu0 %v520_v49 }
 0x271   :  { %v522_v52 = vpop.xlane.xlu0 %521 }
 0x272   :  { %v527_v53 = vrot.slane %v522_v52, %v1827_v15  ;;  %v531_v54 = vrot.slane %v522_v52, %v530_v51  ;;  %v1977_v12 = vrot.slane %v522_v52, %v546_v55  ;;  %v535_v17 = vrot.slane %v522_v52, %v534_v58 }
 0x273   :  { %v539_v27 = vrot.slane %v522_v52, %v538_v21 }
 0x274   :  { %v564_v56 = vsub.f32 %v1874_v60, %v527_v53  ;;  %v565_v57 = vsub.f32 %v1878_v62, %v527_v53  ;;  %v566_v4 = vsub.f32 %v1876_v61, %v531_v54  ;;  %v567_v18 = vsub.f32 %v1880_v63, %v531_v54 }
 0x275   :  { %v554_v62 = vsub.s32 7, %v1823_v10  ;;  %v551_v61 = vrot.slane %v522_v52, %v550_v8  ;;  %v574_v20 = vsub.f32 %v1909_v13, %v1977_v12  ;;  %v568_v22 = vsub.f32 %v1882_v1, %v535_v17 }
 0x276   :  { %v580_v14 = vmul.f32 1.442695, %v564_v56  ;;  %v582_v16 = vmul.f32 1.442695, %v565_v57  ;;  %v584_v60 = vmul.f32 1.442695, %v566_v4  ;;  %v569_v28 = vsub.f32 %v1884_v2, %v535_v17 }
 0x277   :  { %v586_v23 = vmul.f32 1.442695, %v567_v18  ;;  %v555_v63 = vrot.slane %v522_v52, %v554_v62  ;;  %v576_v25 = vsub.f32 %v1927_v24, %v551_v61  ;;  %v600_v26 = vmul.f32 1.442695, %v574_v20 }
 0x278   :  { %1458 = vpow2.f32 %v580_v14  ;;  %v588_v29 = vmul.f32 1.442695, %v568_v22  ;;  %v542_v1 = vsub.s32 4, %v1823_v10  ;;  %v570_v32 = vsub.f32 %v1894_v6, %v539_v27 }
 0x279   :  { %1460 = vpow2.f32 %v582_v16  ;;  %v578_v13 = vsub.f32 %v1948_v37, %v555_v63  ;;  %v604_v31 = vmul.f32 1.442695, %v576_v25  ;;  %v590_v33 = vmul.f32 1.442695, %v569_v28 }
 0x27a   :  { %1462 = vpow2.f32 %v584_v60  ;;  %v543_v2 = vrot.slane %v522_v52, %v542_v1  ;;  %v571_v36 = vsub.f32 %v1899_v9, %v539_v27  ;;  %v592_v37 = vmul.f32 1.442695, %v570_v32 }
 0x27b   :  { %1464 = vpow2.f32 %v586_v23  ;;  %v608_v35 = vmul.f32 1.442695, %v578_v13  ;;  %v577_v48 = vsub.f32 %v1936_v30, %v551_v61 }
 0x27c   :  { %1466 = vpow2.f32 %v600_v26  ;;  %v572_v38 = vsub.f32 %v1889_v3, %v543_v2  ;;  %v594_v39 = vmul.f32 1.442695, %v571_v36  ;;  %v573_v43 = vsub.f32 %v1892_v5, %v543_v2 }
 0x27d   :  { %1468 = vpow2.f32 %v588_v29  ;;  %v575_v3 = vsub.f32 %v1919_v19, %v1977_v12  ;;  %v579_v19 = vsub.f32 %v1952_v40, %v555_v63  ;;  %v606_v52 = vmul.f32 1.442695, %v577_v48 }
 0x27e   :  { %1470 = vpow2.f32 %v604_v31  ;;  %v596_v9 = vmul.f32 1.442695, %v572_v38  ;;  %v598_v46 = vmul.f32 1.442695, %v573_v43 }
 0x27f   :  { %1472 = vpow2.f32 %v590_v33  ;;  %v602_v49 = vmul.f32 1.442695, %v575_v3  ;;  %v610_v54 = vmul.f32 1.442695, %v579_v19 }
 0x280   :  { %1474 = vpow2.f32 %v608_v35 }
 0x281   :  { %1476 = vpow2.f32 %v592_v37 }
 0x282   :  { %1478 = vpow2.f32 %v594_v39 }
 0x283   :  { %1480 = vpow2.f32 %v596_v9 }
 0x284   :  { %1482 = vpow2.f32 %v598_v46 }
 0x285   :  { %v1998_v34 = vpop.eup %1458  ;;  %1484 = vpow2.f32 %v602_v49 }
 0x286   :  { %v2000_v24 = vpop.eup %1460  ;;  %629 = vperm.xlu1 %1418, %v1998_v34   ;;  %1486 = vpow2.f32 %v606_v52 }
 0x287   :  { %632 = vperm.xlu0 %1419, %v2000_v24   ;;  %v2007_v6 = vpop.eup %1462  ;;  %1488 = vpow2.f32 %v610_v54 }
 0x288   :  { %v2011_v41 = vpop.eup %1464 }
 0x289   :  { %v2014_v42 = vpop.eup %1466 }
 0x28a   :  { %635 = vperm.xlu1 %1418, %v2007_v6   ;;  %v2018_v44 = vpop.eup %1468 }
 0x28b   :  { %659 = vperm.xlu0 %1419, %v2014_v42   ;;  %v2021_v45 = vpop.eup %1470 }
 0x28c   :  { %v2026_v47 = vpop.eup %1472 }
 0x28d   :  { %v2029_v5 = vpop.eup %1474 }
 0x28e   :  { %638 = vperm.xlu1 %1418, %v2011_v41   ;;  %v2033_v50 = vpop.eup %1476 }
 0x28f   :  { %665 = vperm.xlu0 %1419, %v2021_v45   ;;  %v2037_v53 = vpop.eup %1478 }
 0x290   :  { %v2040_v56 = vpop.eup %1480 }
 0x291   :  { %v2043_v30 = vpop.eup %1482 }
 0x292   :  { %641 = vperm.xlu1 %1418, %v2018_v44   ;;  %v2046_v57 = vpop.eup %1484 }
 0x293   :  { %671 = vperm.xlu0 %1419, %v2029_v5   ;;  %v2049_v40 = vpop.eup %1486 }
 0x294   :  { %v2052_v4 = vpop.eup %1488 }
 0x296   :  { %644 = vperm.xlu1 %1418, %v2026_v47  }
 0x29a   :  { %647 = vperm.xlu1 %1418, %v2033_v50  }
 0x29e   :  { %650 = vperm.xlu1 %1418, %v2037_v53  }
 0x2a2   :  { %653 = vperm.xlu1 %1418, %v2040_v56  }
 0x2a6   :  { %656 = vperm.xlu1 %1418, %v2043_v30  }
 0x2aa   :  { %662 = vperm.xlu1 %1418, %v2046_v57  }
 0x2ae   :  { %668 = vperm.xlu1 %1418, %v2049_v40  }
 0x2b2   :  { %674 = vperm.xlu1 %1418, %v2052_v4  }
 0x301   :  { %v630_v12 = vpop.permute.xlu1 %629 }
 0x302   :  { %v633_v61 = vpop.permute.xlu0 %632  ;;  %v679_v13 = vrot.slane %v630_v12, %v1903_v11 }
 0x303   :  { %v683_v29 = vrot.slane %v633_v61, %v1897_v7 }
 0x305   :  { %v636_v14 = vpop.permute.xlu1 %635  ;;  %v684_v9 = vsel %vm439_vm2, %v683_v29, %v679_v13 }
 0x306   :  { %v660_v23 = vpop.permute.xlu0 %659  ;;  %v688_v31 = vrot.slane %v636_v14, %v1903_v11 }
 0x307   :  { %v724_v3 = vrot.slane %v660_v23, %v1903_v11 }
 0x309   :  { %v639_v16 = vpop.permute.xlu1 %638 }
 0x30a   :  { %v692_v25 = vrot.slane %v639_v16, %v1897_v7  ;;  %v666_v26 = vpop.permute.xlu0 %665 }
 0x30b   :  { %v733_v49 = vrot.slane %v666_v26, %v1903_v11 }
 0x30c   :  { %v693_v2 = vsel %vm439_vm2, %v692_v25, %v688_v31 }
 0x30d   :  { %v642_v17 = vpop.permute.xlu1 %641  ;;  %v748_v19 = vsel %vm504_vm3, %v693_v2, %v684_v9  ;;  %v1423_v2 = vld [vmem:[#allocation12 + $0x10] sm:$0xff]  }
 0x30e   :  { %v697_v33 = vrot.slane %v642_v17, %v1903_v11  ;;  %v672_v52 = vpop.permute.xlu0 %671 }
 0x311   :  { %v645_v18 = vpop.permute.xlu1 %644 }
 0x312   :  { %v701_v27 = vrot.slane %v645_v18, %v1897_v7 }
 0x314   :  { %v702_v38 = vsel %vm439_vm2, %v701_v27, %v697_v33 }
 0x315   :  { %v648_v60 = vpop.permute.xlu1 %647  ;;  %v749_v12 = vsel %vm506_vm4, %v702_v38, %v748_v19 }
 0x316   :  { %v706_v36 = vrot.slane %v648_v60, %v1903_v11  ;;  %v742_v60 = vrot.slane %v672_v52, %v1903_v11 }
 0x319   :  { %v651_v20 = vpop.permute.xlu1 %650 }
 0x31a   :  { %v710_v32 = vrot.slane %v651_v20, %v1897_v7 }
 0x31c   :  { %v711_v46 = vsel %vm439_vm2, %v710_v32, %v706_v36 }
 0x31d   :  { %v654_v22 = vpop.permute.xlu1 %653  ;;  %v750_v16 = vsel %vm508_vm5, %v711_v46, %v749_v12 }
 0x31e   :  { %v715_v39 = vrot.slane %v654_v22, %v1903_v11 }
 0x321   :  { %v657_v63 = vpop.permute.xlu1 %656 }
 0x322   :  { %v719_v35 = vrot.slane %v657_v63, %v1897_v7 }
 0x324   :  { %v720_v54 = vsel %vm439_vm2, %v719_v35, %v715_v39 }
 0x325   :  { %v663_v28 = vpop.permute.xlu1 %662  ;;  %v751_v61 = vsel %vm510_vm6, %v720_v54, %v750_v16 }
 0x326   :  { %v728_v37 = vrot.slane %v663_v28, %v1897_v7 }
 0x328   :  { %v729_v14 = vsel %vm439_vm2, %v728_v37, %v724_v3 }
 0x329   :  { %v669_v43 = vpop.permute.xlu1 %668  ;;  %v752_v22 = vsel %vm512_vm7, %v729_v14, %v751_v61  ;;  %v820_v14 = vld [vmem:[#allocation6 + $0x18] sm:$0xff]  ;;  %v822_v61 = vld [vmem:[#allocation6 + $0x28] sm:$0xff] }
 0x32a   :  { %v737_v48 = vrot.slane %v669_v43, %v1897_v7 }
 0x32c   :  { %v738_v17 = vsel %vm439_vm2, %v737_v48, %v733_v49 }
 0x32d   :  { %v675_v18 = vpop.permute.xlu1 %674  ;;  %v753_v63 = vsel %vm514_vm8, %v738_v17, %v752_v22  ;;  %v824_v22 = vld [vmem:[#allocation6 + $0x38] sm:$0xff] }
 0x32e   :  { %v746_v20 = vrot.slane %v675_v18, %v1897_v7  ;;  %v819_v18 = vld [vmem:[#allocation6 + $0x10] sm:$0xff] }
 0x330   :  { %v747_v23 = vsel %vm439_vm2, %v746_v20, %v742_v60  ;;  %v818_v20 = vld [vmem:[#allocation6 + $0x8] sm:$0xff] }
 0x331   :  { %v754_v25 = vsel %vm516_vm9, %v747_v23, %v753_v63 }
 0x332   :  { %v756_v26 = vsel %vm519_vm10, %v754_v25, 0.0  ;;  %v817_v25 = vld [vmem:[#allocation6] sm:$0xff] }
 0x333   :  { %757 = vadd.xlane.f32.xlu0 %v756_v26 }
 0x3bc   :  { %v758_v27 = vpop.xlane.xlu0 %757 }
 0x3bd   :  { %1490 = vrcp.f32 %v758_v27  ;;  %v821_v27 = vld [vmem:[#allocation6 + $0x20] sm:$0xff] }
 0x3ca   :  { %v1491_v28 = vpop.eup %1490 }
 0x3cb   :  { %v780_v11 = vrot.slane %v1491_v28, %v542_v1  ;;  %v764_v29 = vrot.slane %v1491_v28, %v1827_v15  ;;  %v792_v31 = vrot.slane %v1491_v28, %v554_v62  ;;  %v768_v35 = vrot.slane %v1491_v28, %v530_v51  ;;  %v1001_v1 = vld [vmem:[#allocation9] sm:$0xff] }
 0x3cc   :  { %v772_v62 = vrot.slane %v1491_v28, %v534_v58  ;;  %v776_v51 = vrot.slane %v1491_v28, %v538_v21  ;;  %v784_v58 = vrot.slane %v1491_v28, %v546_v55  ;;  %v788_v21 = vrot.slane %v1491_v28, %v550_v8  ;;  %v1422_v55 = vld [vmem:[#allocation12 + $0x18] sm:$0xff]   ;;  %v1425_v8 = vld [vmem:[#allocation12] sm:$0xff]  }
 0x3cd   :  { %v809_v7 = vmul.f32 %v2040_v56, %v780_v11  ;;  %v801_v13 = vmul.f32 %v1998_v34, %v764_v29  ;;  %v815_v32 = vmul.f32 %v2029_v5, %v792_v31  ;;  %v802_v33 = vmul.f32 %v2000_v24, %v764_v29  ;;  %1377 = vmatpush3.bf16.msra.mxu1 %v1422_v55 }
 0x3ce   :  { %v803_v15 = vmul.f32 %v2007_v6, %v768_v35  ;;  %v804_v34 = vmul.f32 %v2011_v41, %v768_v35  ;;  %v805_v5 = vmul.f32 %v2018_v44, %v772_v62  ;;  %v806_v24 = vmul.f32 %v2026_v47, %v772_v62  ;;  %1378 = vmatprep.subr.bf16.mxu1 %v1701_v0 }
 0x3cf   :  { %875 = vperm.xlu0 %1419, %v809_v7   ;;  %835 = vperm.xlu1 %1418, %v801_v13   ;;  %v807_v6 = vmul.f32 %v2033_v50, %v776_v51  ;;  %v808_v56 = vmul.f32 %v2037_v53, %v776_v51  ;;  %v810_v41 = vmul.f32 %v2043_v30, %v780_v11  ;;  %v823_v7 = vld [vmem:[#allocation6 + $0x30] sm:$0xff]  ;;  %v826_v13 = vld [vmem:[#allocation6 + $0x48] sm:$0xff] }
 0x3d0   :  { %v811_v44 = vmul.f32 %v2014_v42, %v784_v58  ;;  %v812_v47 = vmul.f32 %v2046_v57, %v784_v58  ;;  %v813_v50 = vmul.f32 %v2021_v45, %v788_v21  ;;  %v814_v53 = vmul.f32 %v2049_v40, %v788_v21  ;;  %v1424_v42 = vld [vmem:[#allocation12 + $0x8] sm:$0xff]  }
 0x3d1   :  { %v816_v30 = vmul.f32 %v2052_v4, %v792_v31  ;;  %1379 = vmatpush3.bf16.msra.mxu1 %v1423_v2  ;;  %v1221_v45 = vadd.s32 4294967264, %v1887_v59  ;;  %v1226_v57 = vadd.s32 4294967256, %v1887_v59  ;;  %v825_v31 = vld [vmem:[#allocation6 + $0x40] sm:$0xff] }
 0x3d2   :  { %1380 = vmatprep.subr.bf16.mxu1 %v1701_v0 }
 0x3d3   :  { %905 = vperm.xlu0 %1419, %v815_v32   ;;  %840 = vperm.xlu1 %1418, %v802_v33   ;;  %v2124_v4 = vsub.s32 %v1221_v45, %v1823_v10  ;;  %v2127_v36 = vsub.s32 %v1226_v57, %v1823_v10 }
 0x3d5   :  { %1381 = vmatpush3.bf16.msra.mxu1 %v1424_v42  ;;  %v827_v42 = vld [vmem:[#allocation6 + $0x50] sm:$0xff] }
 0x3d6   :  { %1382 = vmatprep.subr.bf16.mxu1 %v1701_v0 }
 0x3d7   :  { %845 = vperm.xlu1 %1418, %v803_v15   ;;  %1019 = vrot.lane.b32.xlu0 %v1001_v1, %s1705_s5 }
 0x3d9   :  { %1383 = vmatpush3.bf16.msra.mxu1 %v1425_v8 }
 0x3db   :  { %850 = vperm.xlu1 %1418, %v804_v34  }
 0x3df   :  { %855 = vperm.xlu1 %1418, %v805_v5  }
 0x3e3   :  { %860 = vperm.xlu1 %1418, %v806_v24  }
 0x3e7   :  { %865 = vperm.xlu1 %1418, %v807_v6  }
 0x3eb   :  { %870 = vperm.xlu1 %1418, %v808_v56  }
 0x3ef   :  { %880 = vperm.xlu1 %1418, %v810_v41  }
 0x3f3   :  { %885 = vperm.xlu1 %1418, %v811_v44  }
 0x3f7   :  { %890 = vperm.xlu1 %1418, %v812_v47  }
 0x3fb   :  { %895 = vperm.xlu1 %1418, %v813_v50  }
 0x3ff   :  { %900 = vperm.xlu1 %1418, %v814_v53  }
 0x403   :  { %910 = vperm.xlu1 %1418, %v816_v30  }
 0x44a   :  { %v836_v40 = vpop.permute.xlu1 %835  ;;  %v876_v63 = vpop.permute.xlu0 %875 }
 0x44b   :  { %v1225_v38 = vrot.slane %v836_v40, %v2124_v4  ;;  %v1263_v15 = vrot.slane %v876_v63, %v2124_v4  ;;  %v913_v34 = vmul.f32 %v836_v40, %v817_v25  ;;  %v921_v58 = vmul.f32 %v876_v63, %v825_v31 }
 0x44d   :  { %v929_v45 = vsel %vm139_vm1, %v913_v34, 0.0 }
 0x44e   :  { %v841_v37 = vpop.permute.xlu1 %840 }
 0x44f   :  { %v1230_v39 = vrot.slane %v841_v37, %v2127_v36  ;;  %v914_v32 = vmul.f32 %v841_v37, %v818_v20  ;;  %v965_v37 = vsel %vm139_vm1, %v921_v58, 0.0 }
 0x451   :  { %v1232_v43 = vsel %vm1231_vm11, %v1230_v39, %v1225_v38  ;;  %v930_v21 = vsel %vm139_vm1, %v914_v32, 0.0 }
 0x452   :  { %v846_v9 = vpop.permute.xlu1 %845  ;;  %v931_v38 = vadd.f32 %v930_v21, %v929_v45 }
 0x453   :  { %v1236_v46 = vrot.slane %v846_v9, %v2124_v4  ;;  %v915_v26 = vmul.f32 %v846_v9, %v819_v18  ;;  %v828_v9 = vld [vmem:[#allocation6 + $0x58] sm:$0xff] }
 0x455   :  { %v938_v51 = vsel %vm139_vm1, %v915_v26, 0.0 }
 0x456   :  { %v851_v3 = vpop.permute.xlu1 %850 }
 0x457   :  { %v1240_v59 = vrot.slane %v851_v3, %v2127_v36  ;;  %v916_v60 = vmul.f32 %v851_v3, %v820_v14 }
 0x459   :  { %v1241_v48 = vsel %vm1231_vm11, %v1240_v59, %v1236_v46  ;;  %v939_v33 = vsel %vm139_vm1, %v916_v60, 0.0 }
 0x45a   :  { %v1296_v49 = vsel %vm504_vm3, %v1241_v48, %v1232_v43  ;;  %v856_v10 = vpop.permute.xlu1 %855  ;;  %v940_v44 = vadd.f32 %v939_v33, %v938_v51  ;;  %v832_v51 = vld [vmem:[#allocation6 + $0x78] sm:$0xff] }
 0x45b   :  { %v1245_v52 = vrot.slane %v856_v10, %v2124_v4  ;;  %v917_v62 = vmul.f32 %v856_v10, %v821_v27 }
 0x45c   :  { %v941_v39 = vrot.slane %v940_v44, 4 }
 0x45d   :  { %v947_v30 = vsel %vm139_vm1, %v917_v62, 0.0 }
 0x45e   :  { %v861_v19 = vpop.permute.xlu1 %860 }
 0x45f   :  { %v1249_v54 = vrot.slane %v861_v19, %v2127_v36  ;;  %v918_v29 = vmul.f32 %v861_v19, %v822_v61  ;;  %v829_v61 = vld [vmem:[#allocation6 + $0x60] sm:$0xff] }
 0x461   :  { %v1250_v12 = vsel %vm1231_vm11, %v1249_v54, %v1245_v52  ;;  %v948_v47 = vsel %vm139_vm1, %v918_v29, 0.0  ;;  %v932_v52 = vrot.slane %v931_v38, 4  ;;  %v942_v54 = vadd.f32 %v941_v39, %v940_v44  ;;  %v906_v29 = vpop.permute.xlu0 %905 }
 0x462   :  { %v1297_v16 = vsel %vm506_vm4, %v1250_v12, %v1296_v49  ;;  %v866_v17 = vpop.permute.xlu1 %865  ;;  %v949_v57 = vadd.f32 %v948_v47, %v947_v30 }
 0x463   :  { %v1254_v28 = vrot.slane %v866_v17, %v2124_v4  ;;  %v919_v6 = vmul.f32 %v866_v17, %v823_v7  ;;  %v933_v63 = vadd.f32 %v932_v52, %v931_v38  ;;  %v943_v25 = vrot.slane %v942_v54, 2 }
 0x464   :  { %v950_v48 = vrot.slane %v949_v57, 4 }
 0x465   :  { %v956_v40 = vsel %vm139_vm1, %v919_v6, 0.0  ;;  %v934_v62 = vrot.slane %v933_v63, 2 }
 0x466   :  { %v871_v23 = vpop.permute.xlu1 %870 }
 0x467   :  { %v1258_v11 = vrot.slane %v871_v23, %v2127_v36  ;;  %v920_v35 = vmul.f32 %v871_v23, %v824_v22  ;;  %v951_v23 = vadd.f32 %v950_v48, %v949_v57 }
 0x469   :  { %v1259_v1 = vsel %vm1231_vm11, %v1258_v11, %v1254_v28  ;;  %v957_v50 = vsel %vm139_vm1, %v920_v35, 0.0  ;;  %v830_v28 = vld [vmem:[#allocation6 + $0x68] sm:$0xff]  ;;  %v831_v11 = vld [vmem:[#allocation6 + $0x70] sm:$0xff]  ;;  %v952_v33 = vrot.slane %v951_v23, 2 }
 0x46a   :  { %v1298_v5 = vsel %vm508_vm5, %v1259_v1, %v1297_v16  ;;  %v881_v24 = vpop.permute.xlu1 %880  ;;  %v958_v43 = vadd.f32 %v957_v50, %v956_v40  ;;  %v927_v34 = vmul.f32 %v906_v29, %v831_v11  ;;  %v1020_v11 = vpop.permute.xlu0 %1019 }
 0x46b   :  { %v922_v56 = vmul.f32 %v881_v24, %v826_v13  ;;  %v1267_v41 = vrot.slane %v881_v24, %v2127_v36  ;;  %v953_v30 = vadd.f32 %v952_v33, %v951_v23 }
 0x46c   :  { %v959_v12 = vrot.slane %v958_v43, 4 }
 0x46d   :  { %v1268_v53 = vsel %vm1231_vm11, %v1267_v41, %v1263_v15  ;;  %v966_v55 = vsel %vm139_vm1, %v922_v56, 0.0 }
 0x46e   :  { %v1299_v2 = vsel %vm510_vm6, %v1268_v53, %v1298_v5  ;;  %v886_v8 = vpop.permute.xlu1 %885  ;;  %v967_v3 = vadd.f32 %v966_v55, %v965_v37  ;;  %v960_v26 = vadd.f32 %v959_v12, %v958_v43  ;;  %v944_v5 = vadd.f32 %v943_v25, %v942_v54 }
 0x46f   :  { %v923_v46 = vmul.f32 %v886_v8, %v827_v42  ;;  %v1272_v49 = vrot.slane %v886_v8, %v2124_v4  ;;  %v1290_v53 = vrot.slane %v906_v29, %v2124_v4  ;;  %v992_v42 = vsel %vm139_vm1, %v927_v34, 0.0 }
 0x470   :  { %v968_v14 = vrot.slane %v967_v3, 4  ;;  %v961_v24 = vrot.slane %v960_v26, 2  ;;  %v935_v8 = vadd.f32 %v934_v62, %v933_v63  ;;  %v945_v40 = vrot.slane %v944_v5, 1 }
 0x471   :  { %v974_v16 = vsel %vm139_vm1, %v923_v46, 0.0  ;;  %v954_v46 = vrot.slane %v953_v30, 1 }
 0x472   :  { %v891_v59 = vpop.permute.xlu1 %890  ;;  %v969_v7 = vadd.f32 %v968_v14, %v967_v3  ;;  %v962_v45 = vadd.f32 %v961_v24, %v960_v26 }
 0x473   :  { %v924_v10 = vmul.f32 %v891_v59, %v828_v9  ;;  %v1276_v19 = vrot.slane %v891_v59, %v2127_v36  ;;  %v936_v59 = vrot.slane %v935_v8, 1  ;;  %v955_v14 = vadd.f32 %v954_v46, %v953_v30  ;;  %v1133_v30 = vld [vmem:[#allocation14] sm:$0xff] }
 0x474   :  { %v970_v6 = vrot.slane %v969_v7, 2 }
 0x475   :  { %v975_v17 = vsel %vm139_vm1, %v924_v10, 0.0  ;;  %v1277_v18 = vsel %vm1231_vm11, %v1276_v19, %v1272_v49  ;;  %v946_v19 = vadd.f32 %v945_v40, %v944_v5 }
 0x476   :  { %v976_v60 = vadd.f32 %v975_v17, %v974_v16  ;;  %v896_v20 = vpop.permute.xlu1 %895  ;;  %v1300_v22 = vsel %vm512_vm7, %v1277_v18, %v1299_v2  ;;  %v971_v37 = vadd.f32 %v970_v6, %v969_v7  ;;  %v937_v16 = vadd.f32 %v936_v59, %v935_v8 }
 0x477   :  { %v925_v13 = vmul.f32 %v896_v20, %v829_v61  ;;  %v1281_v35 = vrot.slane %v896_v20, %v2124_v4 }
 0x478   :  { %v977_v27 = vrot.slane %v976_v60, 4  ;;  %v972_v10 = vrot.slane %v971_v37, 1  ;;  %v1010_v20 = vsel %vm504_vm3, %v946_v19, %v937_v16 }
 0x479   :  { %v983_v56 = vsel %vm139_vm1, %v925_v13, 0.0  ;;  %v1011_v25 = vsel %vm506_vm4, %v955_v14, %v1010_v20 }
 0x47a   :  { %v978_v31 = vadd.f32 %v977_v27, %v976_v60  ;;  %v901_v32 = vpop.permute.xlu1 %900  ;;  %v973_v61 = vadd.f32 %v972_v10, %v971_v37 }
 0x47b   :  { %v926_v1 = vmul.f32 %v901_v32, %v830_v28  ;;  %v1285_v15 = vrot.slane %v901_v32, %v2127_v36 }
 0x47c   :  { %v979_v44 = vrot.slane %v978_v31, 2 }
 0x47d   :  { %v984_v41 = vsel %vm139_vm1, %v926_v1, 0.0  ;;  %v1286_v58 = vsel %vm1231_vm11, %v1285_v15, %v1281_v35  ;;  %v1345_v35 = vld [vmem:[%s2216_s7] ss:$0 sm:$0xff]  ;;  %s1706_s7 = smov 96  }
 0x47e   :  { %v985_v47 = vadd.f32 %v984_v41, %v983_v56  ;;  %v911_v21 = vpop.permute.xlu1 %910  ;;  %v1301_v50 = vsel %vm514_vm8, %v1286_v58, %v1300_v22  ;;  %v980_v43 = vadd.f32 %v979_v44, %v978_v31  ;;  %v1352_v56 = vld [vmem:[%s2217_s8] ss:$0 sm:$0xff]  ;;  %s1707_s8 = smov [#allocation16]  }
 0x47f   :  { %v928_v55 = vmul.f32 %v911_v21, %v832_v51  ;;  %v1294_v2 = vrot.slane %v911_v21, %v2127_v36  ;;  %v963_v36 = vrot.slane %v962_v45, 1  ;;  %v1136_v21 = vld [vmem:[#allocation14 + $0x18] sm:$0xff] }
 0x480   :  { %v986_v57 = vrot.slane %v985_v47, 4  ;;  %v981_v52 = vrot.slane %v980_v43, 1  ;;  %1389 = vmatpush3.msra.mxu0 %v1136_v21 }
 0x481   :  { %v993_v38 = vsel %vm139_vm1, %v928_v55, 0.0  ;;  %v1295_v39 = vsel %vm1231_vm11, %v1294_v2, %v1290_v53  ;;  %v964_v17 = vadd.f32 %v963_v36, %v962_v45  ;;  %1390 = vmatprep.subr.mxu0 %v1701_v0  ;;  %v1134_v53 = vld [vmem:[#allocation14 + $0x8] sm:$0xff] }
 0x482   :  { %v987_v9 = vadd.f32 %v986_v57, %v985_v47  ;;  %v994_v3 = vadd.f32 %v993_v38, %v992_v42  ;;  %v2176_v4 = vsel %vm516_vm9, %v1295_v39, %v1301_v50  ;;  %v982_v22 = vadd.f32 %v981_v52, %v980_v43  ;;  %v1135_v50 = vld [vmem:[#allocation14 + $0x10] sm:$0xff] }
 0x483   :  { %v1012_v27 = vsel %vm508_vm5, %v964_v17, %v1011_v25  ;;  %1391 = vmatpush3.msra.mxu0 %v1135_v50 }
 0x484   :  { %v988_v48 = vrot.slane %v987_v9, 2  ;;  %v995_v49 = vrot.slane %v994_v3, 4  ;;  %v1013_v28 = vsel %vm510_vm6, %v973_v61, %v1012_v27  ;;  %1392 = vmatprep.subr.mxu0 %v1701_v0 }
 0x485   :  { %v1014_v7 = vsel %vm512_vm7, %v982_v22, %v1013_v28  ;;  %1393 = vmatpush3.msra.mxu0 %v1134_v53 }
 0x486   :  { %v989_v54 = vadd.f32 %v988_v48, %v987_v9  ;;  %v996_v12 = vadd.f32 %v995_v49, %v994_v3  ;;  %1394 = vmatprep.subr.mxu0 %v1701_v0 }
 0x487   :  { %1395 = vmatpush3.msra.mxu0 %v1133_v30 }
 0x488   :  { %v990_v18 = vrot.slane %v989_v54, 1  ;;  %v997_v60 = vrot.slane %v996_v12, 2 }
 0x48a   :  { %v998_v23 = vadd.f32 %v997_v60, %v996_v12  ;;  %v991_v63 = vadd.f32 %v990_v18, %v989_v54 }
 0x48c   :  { %v999_v26 = vrot.slane %v998_v23, 1  ;;  %v1015_v13 = vsel %vm514_vm8, %v991_v63, %v1014_v7 }
 0x48e   :  { %v1000_v29 = vadd.f32 %v999_v26, %v998_v23 }
 0x490   :  { %v1016_v31 = vsel %vm516_vm9, %v1000_v29, %v1015_v13 }
 0x491   :  { %v1022_v32 = vsel %vm139_vm1, %v1016_v31, %v1020_v11 }
 0x492   :  { %v1023_v33 = vpack.c.bf16 %v1022_v32, %v1022_v32 }
 0x494   :  { %1385 = vmatmul.mubr.msk.bf16.vlgmr.msra.gmra.mxu1 %vm1063_vm12, %v1023_v33 }
 0x554   :  { %v1101_v1 = vpop.f32.mrf.mxu1 }
 0x555   :  { %v1102_v15 = vadd.f32 %v1345_v35, %v1101_v1 }
 0x556   :  { %v1386_v34 = vpop.f32.mrf.mxu1 }
 0x557   :  { %v1351_v62 = vmul.f32 -1.442695, %v1102_v15 }
 0x558   :  { %v1104_v5 = vpop.f32.mrf.mxu1 }
 0x559   :  { %1492 = vpow2.f32 %v1351_v62 }
 0x55a   :  { %v1387_v24 = vpop.f32.mrf.mxu1 }
 0x566   :  { %v1493_v51 = vpop.eup %1492 }
 0x567   :  { %v1110_v6 = vadd.f32 1.0, %v1493_v51 }
 0x569   :  { %1494 = vrcp.f32 %v1110_v6 }
 0x576   :  { %v1495_v41 = vpop.eup %1494 }
 0x577   :  { %v1120_v58 = vmul.f32 %v1495_v41, %v1352_v56  ;;  %v1127_v2 = vsub.f32 1.0, %v1495_v41 }
 0x579   :  { %1122 = vrot.lane.b32.xlu1 %v1120_v58, %s1696_s1  ;;  %s1325_s1 = sshll.u32 %s1707_s8, 4  ;;  %s1326_s1 = int_to_ptr.vmem [resolvable:$true] %s1325_s1 }
 0x57a   :  { %s1638_s22 = scalar_lea.vmem %s1326_s1, 128  ;;  %p1643_p8 = scmp.lt.s32.totalorder %s1326_s1, %s1326_s1 }
 0x57b   :  { %p1639_p7 = scmp.ne.s32.totalorder %s1326_s1, %s1638_s22  ;;  %p1644_p9 = scmp.lt.s32.totalorder %s1638_s22, %s1638_s22 }
 0x57d   :  { %p1645_p10 = por %p1644_p9, %p1643_p8 }
 0x57f   :  { %p1646_p11 = pnand %p1645_p10, %p1639_p7 }
 0x5eb   :  { %v1123_v44 = vpop.permute.xlu1 %1122 }
 0x5ec   :  { %v1125_v47 = vadd.f32 %v1123_v44, %v1102_v15 }
 0x5ee   :  { %1496 = vtanh.f32 %v1125_v47 }
 0x5fb   :  { %v1497_v55 = vpop.eup %1496 }
 0x5fc   :  { %1129 = vrot.lane.b32.xlu0 %v1497_v55, %s1706_s7 }
 0x66e   :  { %v1130_v42 = vpop.permute.xlu0 %1129 }
 0x66f   :  { %v1132_v8 = vmul.f32 %v1130_v42, %v1127_v2 }
 0x671   :  { %1145 = vrot.lane.b32.xlu1 %v1132_v8, %s1706_s7 }
 0x6e3   :  { %v1146_v45 = vpop.permute.xlu1 %1145 }
 0x6e4   :  { %v1304_v57 = vsel %vm139_vm1, %v1146_v45, %v2176_v4  ;;  %1308 = vst.msk [vmem:[#allocation2] sm:$0xff] %vm139_vm1, %v1146_v45  ;;  %1397 = vmatmul.mubr.msk.f32.vlgmr.msra.gmra.mxu0 %vm139_vm1, %v1146_v45 }
 0x6e5   :  { %v1306_v40 = vsel %vm1305_vm13, %v1304_v57, 0.0 }
 0x6e6   :  { %1307 = vst [vmem:[#allocation16] sm:$0xff] %v1306_v40 }
 0x6e7   :  { %1649 = shalt.err (!%p1646_p11)
}
 0x6e8   :  { %1328 = dma.vmem_to_hbm [thread:$0]  %s1326_s1, 128, %s2221_s12, [#allocation17]   ;;  %v1353_v0 = vld [vmem:[%s2219_s10] ss:$0 sm:$0xff] }
 0x6e9   :  { %s1708_s29 = smov [#allocation15]  }
 0x6ea   :  { %s1315_s30 = sshll.u32 %s1708_s29, 4  ;;  %s1316_s30 = int_to_ptr.vmem [resolvable:$true] %s1315_s30 }
 0x6eb   :  { %s1658_s6 = scalar_lea.vmem %s1316_s30, 128  ;;  %p1663_p13 = scmp.lt.s32.totalorder %s1316_s30, %s1316_s30 }
 0x6ec   :  { %p1659_p12 = scmp.ne.s32.totalorder %s1316_s30, %s1658_s6  ;;  %p1664_p0 = scmp.lt.s32.totalorder %s1658_s6, %s1658_s6 }
 0x6ee   :  { %p1665_p1 = por %p1664_p0, %p1663_p13 }
 0x6f0   :  { %p1666_p2 = pnand %p1665_p1, %p1659_p12 }
 0x7a4   :  { %v1215_v37 = vpop.f32.mrf.mxu0 }
 0x7a5   :  { %v1216_v38 = vadd.f32 %v1353_v0, %v1215_v37 }
 0x7a6   :  { %v1398_v39 = vpop.f32.mrf.mxu0 }
 0x7a7   :  { %1219 = vst [vmem:[#allocation15] sm:$0xff] %v1216_v38 }
 0x7a8   :  { %1669 = shalt.err (!%p1666_p2)
}
 0x7a9   :  { %1318 = dma.vmem_to_hbm [thread:$0]  %s1316_s30, 128, %s2220_s11, [#allocation5]  }
 0x7aa   :  { %1686 = dma.done.wait [#allocation5], 128  }
 0x7ab   :  { %1687 = vsyncadd [#allocation5], 4294967168 }
 0x7ac   :  { %1688 = dma.done.wait [#allocation17], 128  }
 0x7ad   :  { %1689 = vsyncadd [#allocation17], 4294967168 }
 0x7ae   :  { %1335 = vsyncpa [#allocation4], 1 }
 0x7af   :  { %1336 = vsyncpa [#allocation7], 1 }
 0x7b0   :  { %1337 = vsyncpa [#allocation10], 1 }
 0x7b1   :  { %1338 = vsyncpa [#allocation13], 1 }
 0x7b2   :  { %1339 = vsyncpa [#allocation5], 1 }
 0x7b3   :  { %1340 = vsyncpa [#allocation17], 1 }

</bundles_post_ra>
